<compile_context>
chip_gen: v6e
topology: v6e:2x2x1
jax: 0.10.0
libtpu: 0.0.40
codegen_flags: <defaults>
</compile_context>

<pallas_src>
import functools

import jax
import jax.numpy as jnp
import numpy as np
from jax.experimental import pallas as pl
from jax.experimental.pallas import tpu as pltpu

try:  # optional, faster host-side assignment; falls back to numpy JV below
    from scipy.optimize import linear_sum_assignment as _scipy_lsa
except Exception:  # pragma: no cover
    _scipy_lsa = None


def _round_up(x, m):
    return ((x + m - 1) // m) * m


# ----------------------------------------------------------------------------
# Pallas kernel: DETR matching-cost blocks for a group of images.
# ----------------------------------------------------------------------------
def _matcher_cost_kernel(logits_ref, pbox_ref, tgt_ref, out_ref, *,
                         w_class, w_bbox, w_giou):
    # logits_ref : (B, Qp, Cp) f32  -- padded classes/queries filled with -1e30
    # pbox_ref   : (B, Qp, 16) f32  -- [cx,cy,w,h, x1,y1,x2,y2, area, pad...]
    # tgt_ref    : (B, 16, Mp) f32  -- rows: cx,cy,w,h, x1,y1,x2,y2, area,
    #                                  label(float, pad=-1), pad...
    # out_ref    : (B, Qp, Mp) f32  -- cost blocks for these images
    B, Qp, Cp = logits_ref.shape
    Mp = tgt_ref.shape[2]

    # --- softmax numerator (exp on EUP); EXACT denominator reciprocal ---
    logits = logits_ref[...]
    mx = jnp.max(logits, axis=-1, keepdims=True)
    e = jnp.exp(logits - mx)                                   # (B, Qp, Cp)
    inv_denom = 1.0 / jnp.sum(e, axis=-1, keepdims=True)       # (B, Qp, 1)

    # --- one-hot built in-kernel from prefetched label row, pre-scaled by
    #     -w_class, so the MXU matmul output is already the weighted term ---
    labels_i = tgt_ref[:, 9:10, :].astype(jnp.int32)           # (B, 1, Mp)
    cls_iota = jax.lax.broadcasted_iota(jnp.int32, (B, Cp, Mp), 1)
    onehot = jnp.where(cls_iota == labels_i, -w_class, 0.0).astype(jnp.bfloat16)

    gathered = jnp.einsum('bqc,bcm->bqm', e.astype(jnp.bfloat16), onehot,
                          preferred_element_type=jnp.float32)  # (B, Qp, Mp)
    cost_class_term = gathered * inv_denom                     # = -w_class*prob

    # --- predicted boxes (conversion + area hoisted to host) ---
    pcx = pbox_ref[:, :, 0:1]
    pcy = pbox_ref[:, :, 1:2]
    pw = pbox_ref[:, :, 2:3]
    ph = pbox_ref[:, :, 3:4]
    px1 = pbox_ref[:, :, 4:5]
    py1 = pbox_ref[:, :, 5:6]
    px2 = pbox_ref[:, :, 6:7]
    py2 = pbox_ref[:, :, 7:8]
    p_area = pbox_ref[:, :, 8:9]                               # (B, Qp, 1)

    # --- target rows (single merged tensor, conversions hoisted) ---
    tcx = tgt_ref[:, 0:1, :]
    tcy = tgt_ref[:, 1:2, :]
    tw = tgt_ref[:, 2:3, :]
    th = tgt_ref[:, 3:4, :]
    tx1 = tgt_ref[:, 4:5, :]
    ty1 = tgt_ref[:, 5:6, :]
    tx2 = tgt_ref[:, 6:7, :]
    ty2 = tgt_ref[:, 7:8, :]
    t_area = tgt_ref[:, 8:9, :]                                # (B, 1, Mp)

    # --- cost_bbox: L1 distance on raw cxcywh ---
    cost_bbox = (jnp.abs(pcx - tcx) + jnp.abs(pcy - tcy)
                 + jnp.abs(pw - tw) + jnp.abs(ph - th))        # (B, Qp, Mp)

    # --- generalized IoU (big (Qp,Mp) divisions via approx EUP reciprocal) ---
    ix1 = jnp.maximum(px1, tx1)
    iy1 = jnp.maximum(py1, ty1)
    ix2 = jnp.minimum(px2, tx2)
    iy2 = jnp.minimum(py2, ty2)
    inter = jnp.maximum(ix2 - ix1, 0.0) * jnp.maximum(iy2 - iy1, 0.0)
    union = p_area + t_area - inter
    iou = inter * pl.reciprocal(union + 1e-8, approx=True)
    ex1 = jnp.minimum(px1, tx1)
    ey1 = jnp.minimum(py1, ty1)
    ex2 = jnp.maximum(px2, tx2)
    ey2 = jnp.maximum(py2, ty2)
    enc = jnp.maximum(ex2 - ex1, 0.0) * jnp.maximum(ey2 - ey1, 0.0)
    giou = iou - (enc - union) * pl.reciprocal(enc + 1e-8, approx=True)

    # --- single-pass weighted combine; class/giou negations folded ---
    out_ref[...] = w_bbox * cost_bbox + cost_class_term + (-w_giou) * giou


def _choose_batch_blocking(bs, Qp, Cp, Mp, budget_bytes=40 << 20):
    """Pick (num_blocks, images_per_block, vmem_estimate_bytes).

    Few, large grid steps amortize the ~0.35us/step overhead; keep >= 2 steps
    when bs >= 2 so v7x's two TensorCores both get work; shrink images/block
    if the VMEM estimate exceeds the budget (v7x: 64 MiB physical VMEM/core).
    """
    num_blocks = 2 if bs >= 2 else 1
    while True:
        b_blk = -(-bs // num_blocks)
        per_img_io = 4 * (Qp * Cp + Qp * 16 + 16 * Mp + Qp * Mp)   # f32 in+out
        per_img_tmp = 2 * (Cp * Mp + Qp * Cp) + 12 * Qp * Mp       # onehot/e/temps
        est = b_blk * (2 * per_img_io + per_img_tmp)               # double-buffered io
        if est <= budget_bytes or b_blk == 1:
            return num_blocks, b_blk, est
        num_blocks = min(bs, num_blocks * 2)


def _pallas_cost_blocks(logits_p, pbox_p, tgt_p, w_class, w_bbox, w_giou,
                        num_blocks, b_blk, vmem_limit_bytes):
    bs_pad, Qp, Cp = logits_p.shape
    Mp = tgt_p.shape[-1]
    kern = functools.partial(_matcher_cost_kernel,
                             w_class=float(w_class),
                             w_bbox=float(w_bbox),
                             w_giou=float(w_giou))
    return pl.pallas_call(
        kern,
        out_shape=jax.ShapeDtypeStruct((bs_pad, Qp, Mp), jnp.float32),
        grid=(num_blocks,),
        in_specs=[
            pl.BlockSpec((b_blk, Qp, Cp), lambda g: (g, 0, 0)),
            pl.BlockSpec((b_blk, Qp, 16), lambda g: (g, 0, 0)),
            pl.BlockSpec((b_blk, 16, Mp), lambda g: (g, 0, 0)),
        ],
        out_specs=pl.BlockSpec((b_blk, Qp, Mp), lambda g: (g, 0, 0)),
        compiler_params=pltpu.CompilerParams(
            dimension_semantics=("parallel",),
            vmem_limit_bytes=int(vmem_limit_bytes)),
    )(logits_p, pbox_p, tgt_p)


# ----------------------------------------------------------------------------
# Host-side helpers.
# ----------------------------------------------------------------------------
def _box_cxcywh_to_xyxy_np(b):
    cx, cy, w, h = b[:, 0], b[:, 1], b[:, 2], b[:, 3]
    return np.stack([cx - 0.5 * w, cy - 0.5 * h, cx + 0.5 * w, cy + 0.5 * h],
                    axis=1)


def _lsa_numpy(cost):
    """Jonker-Volgenant assignment (scipy-compatible output), pure numpy."""
    cost = np.asarray(cost, dtype=np.float64)
    if cost.size == 0:
        return (np.empty(0, dtype=np.int64), np.empty(0, dtype=np.int64))
    transposed = cost.shape[0] > cost.shape[1]
    C = cost.T if transposed else cost            # rows <= cols
    n, m = C.shape
    INF = 1e18
    u = np.zeros(n + 1)
    v = np.zeros(m + 1)
    p = np.zeros(m + 1, dtype=np.int64)           # p[j] = row matched to col j
    way = np.zeros(m + 1, dtype=np.int64)
    for i in range(1, n + 1):
        p[0] = i
        j0 = 0
        minv = np.full(m + 1, INF)
        used = np.zeros(m + 1, dtype=bool)
        while True:
            used[j0] = True
            i0 = p[j0]
            delta = INF
            j1 = 0
            for j in range(1, m + 1):
                if not used[j]:
                    cur = C[i0 - 1, j - 1] - u[i0] - v[j]
                    if cur < minv[j]:
                        minv[j] = cur
                        way[j] = j0
                    if minv[j] < delta:
                        delta = minv[j]
                        j1 = j
            for j in range(m + 1):
                if used[j]:
                    u[p[j]] += delta
                    v[j] -= delta
                else:
                    minv[j] -= delta
            j0 = j1
            if p[j0] == 0:
                break
        while True:
            j1 = way[j0]
            p[j0] = p[j1]
            j0 = j1
            if j0 == 0:
                break
    rows, cols = [], []
    for j in range(1, m + 1):
        if p[j] != 0:
            rows.append(p[j] - 1)
            cols.append(j - 1)
    rows = np.asarray(rows, dtype=np.int64)
    cols = np.asarray(cols, dtype=np.int64)
    if transposed:
        rows, cols = cols, rows
    order = np.argsort(rows, kind="stable")
    return rows[order], cols[order]


def _linear_sum_assignment(cost):
    if _scipy_lsa is not None:
        i, j = _scipy_lsa(np.asarray(cost, np.float64))
        return np.asarray(i, np.int64), np.asarray(j, np.int64)
    return _lsa_numpy(cost)


class HungarianMatcher:
    """JAX/Pallas re-implementation of the DETR HungarianMatcher forward."""

    def __init__(self, cost_class=1.0, cost_bbox=1.0, cost_giou=1.0):
        assert cost_class != 0 or cost_bbox != 0 or cost_giou != 0, \
            "all costs cant be 0"
        self.cost_class = cost_class
        self.cost_bbox = cost_bbox
        self.cost_giou = cost_giou
        self.last_cost_per_image = None   # unpadded (Q, n_b) blocks, for tests

    def __call__(self, outputs, targets):
        pred_logits = np.asarray(outputs["pred_logits"], np.float32)
        pred_boxes = np.asarray(outputs["pred_boxes"], np.float32)
        bs, Q, C = pred_logits.shape
        sizes = [int(np.asarray(t["labels"]).reshape(-1).shape[0])
                 for t in targets]

        Qp = _round_up(Q, 128)                       # clean bf16/MXU tiles
        Cp = _round_up(max(C, 1), 128)
        Mp = _round_up(max(max(sizes), 1), 128)
        num_blocks, b_blk, vmem_est = _choose_batch_blocking(bs, Qp, Cp, Mp)
        bs_pad = num_blocks * b_blk
        vmem_limit = min(max(vmem_est + (8 << 20), 32 << 20), 48 << 20)

        # Padded / merged host-side inputs.
        logits_p = np.full((bs_pad, Qp, Cp), -1e30, np.float32)
        logits_p[:bs, :Q, :C] = pred_logits

        pbox_p = np.zeros((bs_pad, Qp, 16), np.float32)
        pbox_p[:bs, :Q, 0:4] = pred_boxes
        pxyxy = _box_cxcywh_to_xyxy_np(
            pred_boxes.reshape(-1, 4)).reshape(bs, Q, 4)
        pbox_p[:bs, :Q, 4:8] = pxyxy
        pbox_p[:bs, :Q, 8] = ((pxyxy[..., 2] - pxyxy[..., 0])
                              * (pxyxy[..., 3] - pxyxy[..., 1]))

        tgt_p = np.zeros((bs_pad, 16, Mp), np.float32)
        tgt_p[:, 9, :] = -1.0                         # label row; -1 = no match
        for b, t in enumerate(targets):
            labels = np.asarray(t["labels"], np.int64).reshape(-1)
            boxes = np.asarray(t["boxes"], np.float32).reshape(-1, 4)
            n = labels.shape[0]
            if n == 0:
                continue
            txyxy = _box_cxcywh_to_xyxy_np(boxes)
            tgt_p[b, 0:4, :n] = boxes.T
            tgt_p[b, 4:8, :n] = txyxy.T
            tgt_p[b, 8, :n] = ((txyxy[:, 2] - txyxy[:, 0])
                               * (txyxy[:, 3] - txyxy[:, 1]))
            tgt_p[b, 9, :n] = labels.astype(np.float32)

        cost_dev = _pallas_cost_blocks(
            jnp.asarray(logits_p), jnp.asarray(pbox_p), jnp.asarray(tgt_p),
            self.cost_class, self.cost_bbox, self.cost_giou,
            num_blocks, b_blk, vmem_limit)
        cost_dev = jax.block_until_ready(cost_dev)

        # Stream each image's UNPADDED cost block to host asynchronously and
        # overlap the device->host copies with the host assignment solves.
        per_image_dev = []
        for b in range(bs):
            n = sizes[b]
            if n == 0:
                per_image_dev.append(None)
                continue
            blk = cost_dev[b, :Q, :n]
            try:
                blk.copy_to_host_async()
            except AttributeError:
                pass
            per_image_dev.append(blk)

        indices = []
        host_blocks = []
        for b in range(bs):
            n = sizes[b]
            if n == 0:
                host_blocks.append(np.zeros((Q, 0), np.float32))
                indices.append((np.empty(0, np.int64), np.empty(0, np.int64)))
                continue
            c = np.asarray(per_image_dev[b])
            host_blocks.append(c)
            # TODO(synk): the Hungarian solve itself is sequential, data-
            # dependent control flow and stays on host (no Pallas equivalent).
            i, j = _linear_sum_assignment(c)
            indices.append((i.astype(np.int64), j.astype(np.int64)))
        self.last_cost_per_image = host_blocks
        return indices


# ----------------------------------------------------------------------------
# Float64 numpy reference for a single image (sanity check).
# ----------------------------------------------------------------------------
def _reference_cost_np(logits, pboxes, labels, tboxes, wc, wb, wg):
    logits = np.asarray(logits, np.float64)
    pboxes = np.asarray(pboxes, np.float64)
    tboxes = np.asarray(tboxes, np.float64)
    z = logits - logits.max(-1, keepdims=True)
    p = np.exp(z)
    p /= p.sum(-1, keepdims=True)
    cost_class = -p[:, labels]
    cost_bbox = np.abs(pboxes[:, None, :] - tboxes[None, :, :]).sum(-1)
    bx = _box_cxcywh_to_xyxy_np(pboxes)
    tx = _box_cxcywh_to_xyxy_np(tboxes)
    area_p = (bx[:, 2] - bx[:, 0]) * (bx[:, 3] - bx[:, 1])
    area_t = (tx[:, 2] - tx[:, 0]) * (tx[:, 3] - tx[:, 1])
    lt = np.maximum(bx[:, None, :2], tx[None, :, :2])
    rb = np.minimum(bx[:, None, 2:], tx[None, :, 2:])
    wh = np.clip(rb - lt, 0.0, None)
    inter = wh[..., 0] * wh[..., 1]
    union = area_p[:, None] + area_t[None, :] - inter
    iou = inter / union
    lt2 = np.minimum(bx[:, None, :2], tx[None, :, :2])
    rb2 = np.maximum(bx[:, None, 2:], tx[None, :, 2:])
    wh2 = np.clip(rb2 - lt2, 0.0, None)
    enc = wh2[..., 0] * wh2[..., 1]
    giou = iou - (enc - union) / enc
    return wb * cost_bbox + wc * cost_class - wg * giou


if __name__ == "__main__":
    key = jax.random.PRNGKey(0)
    bs, num_queries, num_classes = 2, 16, 20
    sizes = [3, 5]

    k1, k2, k3, k4 = jax.random.split(key, 4)
    pred_logits = jax.random.normal(k1, (bs, num_queries, num_classes),
                                    dtype=jnp.float32)
    pred_boxes = jax.nn.sigmoid(
        jax.random.normal(k2, (bs, num_queries, 4), dtype=jnp.float32))

    targets = []
    lk = jax.random.split(k3, bs)
    bk = jax.random.split(k4, bs)
    for b in range(bs):
        n = sizes[b]
        labels = jax.random.randint(lk[b], (n,), 0, num_classes)
        cxcy = jax.random.uniform(bk[b], (n, 2), minval=0.25, maxval=0.75)
        wh = jax.random.uniform(jax.random.fold_in(bk[b], 1), (n, 2),
                                minval=0.05, maxval=0.4)
        boxes = jnp.concatenate([cxcy, wh], axis=-1)
        targets.append({"labels": np.asarray(labels), "boxes": np.asarray(boxes)})

    outputs = {"pred_logits": pred_logits, "pred_boxes": pred_boxes}
    matcher = HungarianMatcher(cost_class=1.0, cost_bbox=5.0, cost_giou=2.0)
    indices = matcher(outputs, targets)

    # --- sanity checks against a float64 numpy reference ---
    pl_np = np.asarray(pred_logits)
    pb_np = np.asarray(pred_boxes)
    for b in range(bs):
        n = sizes[b]
        ref = _reference_cost_np(pl_np[b], pb_np[b],
                                 np.asarray(targets[b]["labels"], np.int64),
                                 np.asarray(targets[b]["boxes"], np.float64),
                                 wc=1.0, wb=5.0, wg=2.0)
        got = matcher.last_cost_per_image[b]
        assert got.shape == (num_queries, n)
        assert np.allclose(got, ref, rtol=1e-2, atol=3e-2), \
            f"cost block mismatch for image {b}"
        i, j = indices[b]
        assert i.shape[0] == j.shape[0] == min(num_queries, n)
        assert len(np.unique(i)) == len(i) and len(np.unique(j)) == len(j)

    print("KERNEL_OK")
</pallas_src>

<mosaic_0001>
module attributes {stable_mosaic.version = 11 : i64} {
  func.func @_matcher_cost_kernel(%arg0: i32, %arg1: memref<1x128x128xf32, #tpu.memory_space<vmem>>, %arg2: memref<1x128x16xf32, #tpu.memory_space<vmem>>, %arg3: memref<1x16x128xf32, #tpu.memory_space<vmem>>, %arg4: memref<1x128x128xf32, #tpu.memory_space<vmem>>) attributes {dimension_semantics = [#tpu.dimension_semantics<parallel>], iteration_bounds = array<i64: 2>, scalar_prefetch = 0 : i64, scratch_operands = 0 : i64, tpu.core_type = #tpu.core_type<tc>, window_params = [{transform_indices = @transform_0, window_bounds = array<i64: 1, 128, 128>}, {transform_indices = @transform_1, window_bounds = array<i64: 1, 128, 16>}, {transform_indices = @transform_2, window_bounds = array<i64: 1, 16, 128>}, {transform_indices = @transform_3, window_bounds = array<i64: 1, 128, 128>}]} {
    %c0 = arith.constant 0 : index
    %c0_0 = arith.constant 0 : index
    %c0_1 = arith.constant 0 : index
    %0 = vector.load %arg1[%c0, %c0_0, %c0_1] : memref<1x128x128xf32, #tpu.memory_space<vmem>>, vector<1x128x128xf32>
    %cst = arith.constant dense<0xFF800000> : vector<1x128xf32>
    %1 = vector.multi_reduction <maximumf>, %0, %cst [2] : vector<1x128x128xf32> to vector<1x128xf32>
    %2 = vector.shape_cast %1 : vector<1x128xf32> to vector<1x128x1xf32>
    %3 = vector.broadcast %2 : vector<1x128x1xf32> to vector<1x128x128xf32>
    %4 = arith.subf %0, %3 : vector<1x128x128xf32>
    %5 = math.exp %4 : vector<1x128x128xf32>
    %cst_2 = arith.constant dense<0.000000e+00> : vector<1x128xf32>
    %6 = vector.multi_reduction <add>, %5, %cst_2 [2] : vector<1x128x128xf32> to vector<1x128xf32>
    %7 = vector.shape_cast %6 : vector<1x128xf32> to vector<1x128x1xf32>
    %cst_3 = arith.constant 1.000000e+00 : f32
    %8 = vector.broadcast %cst_3 : f32 to vector<1x128x1xf32>
    %9 = arith.divf %8, %7 : vector<1x128x1xf32>
    %c0_4 = arith.constant 0 : index
    %c9 = arith.constant 9 : index
    %c0_5 = arith.constant 0 : index
    %10 = vector.load %arg3[%c0_4, %c9, %c0_5] : memref<1x16x128xf32, #tpu.memory_space<vmem>>, vector<1x1x128xf32>
    %11 = arith.fptosi %10 : vector<1x1x128xf32> to vector<1x1x128xi32>
    %12 = tpu.iota {dimensions = array<i32: 1>} : vector<1x128x128xi32>
    %13 = vector.broadcast %11 : vector<1x1x128xi32> to vector<1x128x128xi32>
    %14 = arith.cmpi eq, %12, %13 : vector<1x128x128xi32>
    %cst_6 = arith.constant -1.000000e+00 : f32
    %cst_7 = arith.constant 0.000000e+00 : f32
    %15 = vector.broadcast %cst_6 : f32 to vector<1x128x128xf32>
    %16 = vector.broadcast %cst_7 : f32 to vector<1x128x128xf32>
    %17 = arith.select %14, %15, %16 : vector<1x128x128xi1>, vector<1x128x128xf32>
    %18 = arith.truncf %17 : vector<1x128x128xf32> to vector<1x128x128xbf16>
    %19 = arith.truncf %5 : vector<1x128x128xf32> to vector<1x128x128xbf16>
    "tpu.trace_start"() <{level = 10 : i32, message = "bqc,bcm->bqm"}> : () -> ()
    %cst_8 = arith.constant dense<0.000000e+00> : vector<1x128x128xf32>
    %20 = tpu.matmul %19, %18, %cst_8 {dimension_numbers = #tpu.dot_dimension_numbers<[2], [1], [1], [2], [0, 0, 0, 1, 1, 2], [0], [0]>} : vector<1x128x128xbf16>, vector<1x128x128xbf16>, vector<1x128x128xf32> -> vector<1x128x128xf32>
    "tpu.trace_stop"() : () -> ()
    %21 = vector.broadcast %9 : vector<1x128x1xf32> to vector<1x128x128xf32>
    %22 = arith.mulf %20, %21 : vector<1x128x128xf32>
    %c0_9 = arith.constant 0 : index
    %c0_10 = arith.constant 0 : index
    %c0_11 = arith.constant 0 : index
    %23 = vector.load %arg2[%c0_9, %c0_10, %c0_11] : memref<1x128x16xf32, #tpu.memory_space<vmem>>, vector<1x128x1xf32>
    %c0_12 = arith.constant 0 : index
    %c0_13 = arith.constant 0 : index
    %c1 = arith.constant 1 : index
    %24 = vector.load %arg2[%c0_12, %c0_13, %c1] : memref<1x128x16xf32, #tpu.memory_space<vmem>>, vector<1x128x1xf32>
    %c0_14 = arith.constant 0 : index
    %c0_15 = arith.constant 0 : index
    %c2 = arith.constant 2 : index
    %25 = vector.load %arg2[%c0_14, %c0_15, %c2] : memref<1x128x16xf32, #tpu.memory_space<vmem>>, vector<1x128x1xf32>
    %c0_16 = arith.constant 0 : index
    %c0_17 = arith.constant 0 : index
    %c3 = arith.constant 3 : index
    %26 = vector.load %arg2[%c0_16, %c0_17, %c3] : memref<1x128x16xf32, #tpu.memory_space<vmem>>, vector<1x128x1xf32>
    %c0_18 = arith.constant 0 : index
    %c0_19 = arith.constant 0 : index
    %c4 = arith.constant 4 : index
    %27 = vector.load %arg2[%c0_18, %c0_19, %c4] : memref<1x128x16xf32, #tpu.memory_space<vmem>>, vector<1x128x1xf32>
    %c0_20 = arith.constant 0 : index
    %c0_21 = arith.constant 0 : index
    %c5 = arith.constant 5 : index
    %28 = vector.load %arg2[%c0_20, %c0_21, %c5] : memref<1x128x16xf32, #tpu.memory_space<vmem>>, vector<1x128x1xf32>
    %c0_22 = arith.constant 0 : index
    %c0_23 = arith.constant 0 : index
    %c6 = arith.constant 6 : index
    %29 = vector.load %arg2[%c0_22, %c0_23, %c6] : memref<1x128x16xf32, #tpu.memory_space<vmem>>, vector<1x128x1xf32>
    %c0_24 = arith.constant 0 : index
    %c0_25 = arith.constant 0 : index
    %c7 = arith.constant 7 : index
    %30 = vector.load %arg2[%c0_24, %c0_25, %c7] : memref<1x128x16xf32, #tpu.memory_space<vmem>>, vector<1x128x1xf32>
    %c0_26 = arith.constant 0 : index
    %c0_27 = arith.constant 0 : index
    %c8 = arith.constant 8 : index
    %31 = vector.load %arg2[%c0_26, %c0_27, %c8] : memref<1x128x16xf32, #tpu.memory_space<vmem>>, vector<1x128x1xf32>
    %c0_28 = arith.constant 0 : index
    %c0_29 = arith.constant 0 : index
    %c0_30 = arith.constant 0 : index
    %32 = vector.load %arg3[%c0_28, %c0_29, %c0_30] : memref<1x16x128xf32, #tpu.memory_space<vmem>>, vector<1x1x128xf32>
    %c0_31 = arith.constant 0 : index
    %c1_32 = arith.constant 1 : index
    %c0_33 = arith.constant 0 : index
    %33 = vector.load %arg3[%c0_31, %c1_32, %c0_33] : memref<1x16x128xf32, #tpu.memory_space<vmem>>, vector<1x1x128xf32>
    %c0_34 = arith.constant 0 : index
    %c2_35 = arith.constant 2 : index
    %c0_36 = arith.constant 0 : index
    %34 = vector.load %arg3[%c0_34, %c2_35, %c0_36] : memref<1x16x128xf32, #tpu.memory_space<vmem>>, vector<1x1x128xf32>
    %c0_37 = arith.constant 0 : index
    %c3_38 = arith.constant 3 : index
    %c0_39 = arith.constant 0 : index
    %35 = vector.load %arg3[%c0_37, %c3_38, %c0_39] : memref<1x16x128xf32, #tpu.memory_space<vmem>>, vector<1x1x128xf32>
    %c0_40 = arith.constant 0 : index
    %c4_41 = arith.constant 4 : index
    %c0_42 = arith.constant 0 : index
    %36 = vector.load %arg3[%c0_40, %c4_41, %c0_42] : memref<1x16x128xf32, #tpu.memory_space<vmem>>, vector<1x1x128xf32>
    %c0_43 = arith.constant 0 : index
    %c5_44 = arith.constant 5 : index
    %c0_45 = arith.constant 0 : index
    %37 = vector.load %arg3[%c0_43, %c5_44, %c0_45] : memref<1x16x128xf32, #tpu.memory_space<vmem>>, vector<1x1x128xf32>
    %c0_46 = arith.constant 0 : index
    %c6_47 = arith.constant 6 : index
    %c0_48 = arith.constant 0 : index
    %38 = vector.load %arg3[%c0_46, %c6_47, %c0_48] : memref<1x16x128xf32, #tpu.memory_space<vmem>>, vector<1x1x128xf32>
    %c0_49 = arith.constant 0 : index
    %c7_50 = arith.constant 7 : index
    %c0_51 = arith.constant 0 : index
    %39 = vector.load %arg3[%c0_49, %c7_50, %c0_51] : memref<1x16x128xf32, #tpu.memory_space<vmem>>, vector<1x1x128xf32>
    %c0_52 = arith.constant 0 : index
    %c8_53 = arith.constant 8 : index
    %c0_54 = arith.constant 0 : index
    %40 = vector.load %arg3[%c0_52, %c8_53, %c0_54] : memref<1x16x128xf32, #tpu.memory_space<vmem>>, vector<1x1x128xf32>
    %41 = vector.broadcast %23 : vector<1x128x1xf32> to vector<1x128x128xf32>
    %42 = vector.broadcast %32 : vector<1x1x128xf32> to vector<1x128x128xf32>
    %43 = arith.subf %41, %42 : vector<1x128x128xf32>
    %44 = math.absf %43 : vector<1x128x128xf32>
    %45 = vector.broadcast %24 : vector<1x128x1xf32> to vector<1x128x128xf32>
    %46 = vector.broadcast %33 : vector<1x1x128xf32> to vector<1x128x128xf32>
    %47 = arith.subf %45, %46 : vector<1x128x128xf32>
    %48 = math.absf %47 : vector<1x128x128xf32>
    %49 = arith.addf %44, %48 : vector<1x128x128xf32>
    %50 = vector.broadcast %25 : vector<1x128x1xf32> to vector<1x128x128xf32>
    %51 = vector.broadcast %34 : vector<1x1x128xf32> to vector<1x128x128xf32>
    %52 = arith.subf %50, %51 : vector<1x128x128xf32>
    %53 = math.absf %52 : vector<1x128x128xf32>
    %54 = arith.addf %49, %53 : vector<1x128x128xf32>
    %55 = vector.broadcast %26 : vector<1x128x1xf32> to vector<1x128x128xf32>
    %56 = vector.broadcast %35 : vector<1x1x128xf32> to vector<1x128x128xf32>
    %57 = arith.subf %55, %56 : vector<1x128x128xf32>
    %58 = math.absf %57 : vector<1x128x128xf32>
    %59 = arith.addf %54, %58 : vector<1x128x128xf32>
    %60 = vector.broadcast %27 : vector<1x128x1xf32> to vector<1x128x128xf32>
    %61 = vector.broadcast %36 : vector<1x1x128xf32> to vector<1x128x128xf32>
    %62 = arith.maximumf %60, %61 : vector<1x128x128xf32>
    %63 = vector.broadcast %28 : vector<1x128x1xf32> to vector<1x128x128xf32>
    %64 = vector.broadcast %37 : vector<1x1x128xf32> to vector<1x128x128xf32>
    %65 = arith.maximumf %63, %64 : vector<1x128x128xf32>
    %66 = vector.broadcast %29 : vector<1x128x1xf32> to vector<1x128x128xf32>
    %67 = vector.broadcast %38 : vector<1x1x128xf32> to vector<1x128x128xf32>
    %68 = arith.minimumf %66, %67 : vector<1x128x128xf32>
    %69 = vector.broadcast %30 : vector<1x128x1xf32> to vector<1x128x128xf32>
    %70 = vector.broadcast %39 : vector<1x1x128xf32> to vector<1x128x128xf32>
    %71 = arith.minimumf %69, %70 : vector<1x128x128xf32>
    %72 = arith.subf %68, %62 : vector<1x128x128xf32>
    %cst_55 = arith.constant 0.000000e+00 : f32
    %73 = vector.broadcast %cst_55 : f32 to vector<1x128x128xf32>
    %74 = arith.maximumf %72, %73 : vector<1x128x128xf32>
    %75 = arith.subf %71, %65 : vector<1x128x128xf32>
    %cst_56 = arith.constant 0.000000e+00 : f32
    %76 = vector.broadcast %cst_56 : f32 to vector<1x128x128xf32>
    %77 = arith.maximumf %75, %76 : vector<1x128x128xf32>
    %78 = arith.mulf %74, %77 : vector<1x128x128xf32>
    %79 = vector.broadcast %31 : vector<1x128x1xf32> to vector<1x128x128xf32>
    %80 = vector.broadcast %40 : vector<1x1x128xf32> to vector<1x128x128xf32>
    %81 = arith.addf %79, %80 : vector<1x128x128xf32>
    %82 = arith.subf %81, %78 : vector<1x128x128xf32>
    %cst_57 = arith.constant 9.99999993E-9 : f32
    %83 = vector.broadcast %cst_57 : f32 to vector<1x128x128xf32>
    %84 = arith.addf %82, %83 : vector<1x128x128xf32>
    %85 = tpu.reciprocal %84 {approx = true} : vector<1x128x128xf32> -> vector<1x128x128xf32>
    %86 = arith.mulf %78, %85 : vector<1x128x128xf32>
    %87 = vector.broadcast %27 : vector<1x128x1xf32> to vector<1x128x128xf32>
    %88 = vector.broadcast %36 : vector<1x1x128xf32> to vector<1x128x128xf32>
    %89 = arith.minimumf %87, %88 : vector<1x128x128xf32>
    %90 = vector.broadcast %28 : vector<1x128x1xf32> to vector<1x128x128xf32>
    %91 = vector.broadcast %37 : vector<1x1x128xf32> to vector<1x128x128xf32>
    %92 = arith.minimumf %90, %91 : vector<1x128x128xf32>
    %93 = vector.broadcast %29 : vector<1x128x1xf32> to vector<1x128x128xf32>
    %94 = vector.broadcast %38 : vector<1x1x128xf32> to vector<1x128x128xf32>
    %95 = arith.maximumf %93, %94 : vector<1x128x128xf32>
    %96 = vector.broadcast %30 : vector<1x128x1xf32> to vector<1x128x128xf32>
    %97 = vector.broadcast %39 : vector<1x1x128xf32> to vector<1x128x128xf32>
    %98 = arith.maximumf %96, %97 : vector<1x128x128xf32>
    %99 = arith.subf %95, %89 : vector<1x128x128xf32>
    %cst_58 = arith.constant 0.000000e+00 : f32
    %100 = vector.broadcast %cst_58 : f32 to vector<1x128x128xf32>
    %101 = arith.maximumf %99, %100 : vector<1x128x128xf32>
    %102 = arith.subf %98, %92 : vector<1x128x128xf32>
    %cst_59 = arith.constant 0.000000e+00 : f32
    %103 = vector.broadcast %cst_59 : f32 to vector<1x128x128xf32>
    %104 = arith.maximumf %102, %103 : vector<1x128x128xf32>
    %105 = arith.mulf %101, %104 : vector<1x128x128xf32>
    %106 = arith.subf %105, %82 : vector<1x128x128xf32>
    %cst_60 = arith.constant 9.99999993E-9 : f32
    %107 = vector.broadcast %cst_60 : f32 to vector<1x128x128xf32>
    %108 = arith.addf %105, %107 : vector<1x128x128xf32>
    %109 = tpu.reciprocal %108 {approx = true} : vector<1x128x128xf32> -> vector<1x128x128xf32>
    %110 = arith.mulf %106, %109 : vector<1x128x128xf32>
    %111 = arith.subf %86, %110 : vector<1x128x128xf32>
    %cst_61 = arith.constant 5.000000e+00 : f32
    %112 = vector.broadcast %cst_61 : f32 to vector<1x128x128xf32>
    %113 = arith.mulf %112, %59 : vector<1x128x128xf32>
    %114 = arith.addf %113, %22 : vector<1x128x128xf32>
    %cst_62 = arith.constant -2.000000e+00 : f32
    %115 = vector.broadcast %cst_62 : f32 to vector<1x128x128xf32>
    %116 = arith.mulf %115, %111 : vector<1x128x128xf32>
    %117 = arith.addf %114, %116 : vector<1x128x128xf32>
    %c0_63 = arith.constant 0 : index
    %c0_64 = arith.constant 0 : index
    %c0_65 = arith.constant 0 : index
    %118 = vector.load %arg4[%c0_63, %c0_64, %c0_65] : memref<1x128x128xf32, #tpu.memory_space<vmem>>, vector<1x128x128xf32>
    tpu.vector_store %arg4[%c0_63, %c0_64, %c0_65], %117 {strides = array<i32>} : memref<1x128x128xf32, #tpu.memory_space<vmem>>, vector<1x128x128xf32>,
    return
  }
  func.func @transform_0(%arg0: i32) -> (i32, i32, i32) {
    %c0_i32 = arith.constant 0 : i32
    %c0_i32_0 = arith.constant 0 : i32
    %c0_i32_1 = arith.constant 0 : i32
    return %arg0, %c0_i32, %c0_i32_0 : i32, i32, i32
  }
  func.func @transform_1(%arg0: i32) -> (i32, i32, i32) {
    %c0_i32 = arith.constant 0 : i32
    %c0_i32_0 = arith.constant 0 : i32
    %c0_i32_1 = arith.constant 0 : i32
    return %arg0, %c0_i32, %c0_i32_0 : i32, i32, i32
  }
  func.func @transform_2(%arg0: i32) -> (i32, i32, i32) {
    %c0_i32 = arith.constant 0 : i32
    %c0_i32_0 = arith.constant 0 : i32
    %c0_i32_1 = arith.constant 0 : i32
    return %arg0, %c0_i32, %c0_i32_0 : i32, i32, i32
  }
  func.func @transform_3(%arg0: i32) -> (i32, i32, i32) {
    %c0_i32 = arith.constant 0 : i32
    %c0_i32_0 = arith.constant 0 : i32
    %c0_i32_1 = arith.constant 0 : i32
    return %arg0, %c0_i32, %c0_i32_0 : i32, i32, i32
  }
}

</mosaic_0001>

<bundles_post_ra>
// kernel: tpu_custom_call.1
= control target key start
LH: loop header
LB: loop body
LE: loop exit
PB: predicated region body
PF: predicated region fallthrough
CT: control target
= control target key end

     0   :  { %8 = vsyncpa [#allocation3], 0  ;;  %s4261_s0 = inlined_call_operand.vmem [shape: f32[2,128,128], index: 0, kind: input, shape index: {}]   ;;  %s4262_s1 = inlined_call_operand.vmem [shape: f32[2,128,16], index: 1, kind: input, shape index: {}]   ;;  %s4263_s2 = inlined_call_operand.vmem [shape: f32[2,16,128], index: 2, kind: input, shape index: {}]   ;;  %s4264_s3 = inlined_call_operand.hbm [shape: f32[2,128,128], index: 3, kind: output, shape index: {}]  }
   0x1   :  { %10 = vsyncpa [#allocation3 + $0x1], 0  ;;  %s2417_s12 = smov 0   ;;  %s2419_s13 = smov 0  }
   0x2   :  { %s2421_s14 = smov 0   ;;  %s2423_s15 = smov 0  }
   0x3 LB: > { %s2438_s16 = sadd.s32 4294967295, %s2382_s15   ;;  %s2011_s17 = sadd.s32 4294967294, %s2382_s15   ;;  %s2382_s15 = sphi %s2423_s15, %s4594_s15   ;;  %s2378_s14 = sphi %s2421_s14, %s4593_s14   ;;  %s2374_s13 = sphi %s2419_s13, %s4592_s13   ;;  %s2370_s12 = sphi %s2417_s12, %s4591_s12  }
   0x4   : > { %s2442_s18 = sadd.s32 1, %s2382_s15   ;;  %s101_s19 = sadd.s32 1, %s2378_s14 }
   0x5   : > { %s98_s20 = ssub.s32 %s2382_s15, %s2442_s18  ;;  %p111_p0 = scmp.ne.s32.totalorder %s2378_s14, %s2374_s13 }
   0x6   : > { %p99_p1 = scmp.eq.s32.totalorder %s98_s20, 0  ;;  %p112_p2 = scmp.eq.s32.totalorder %s2438_s16, 1 }
   0x7   : > { %p117_p3 = scmp.ne.s32.totalorder %s2374_s13, %s2370_s12  ;;  %p118_p4 = scmp.eq.s32.totalorder %s2011_s17, 1 }
   0x8   : > { %s2453_s21 = scalar_select %p99_p1, %s2378_s14, %s101_s19  }
   0x9   : > { %p2455_p5 = por %p112_p2, %p111_p0  ;;  %p2459_p6 = por %p118_p4, %p117_p3 }
   0xa   : > { %p2014_p7 = scmp.ge.s32.totalorder %s2382_s15, 1  ;;  %p160_p8 = scmp.lt.s32.totalorder %s2382_s15, 3 }
   0xc   : > { %p161_p9 = pnand %p2014_p7, %p160_p8 }
   0xe   : > { %164 = sbr.rel (%p161_p9) target bundleno = 647 (0x287), region = 32 }
  0x13   : > { %p194_p10 = scmp.lt.s32.totalorder %s2438_s16, 1  ;;  %v2384_v0 = vmov 0   ;;  %v372_v5 = vlaneseq  ;;  %v2385_v26 = vmov -1.0|-1.0   ;;  %v2386_v55 = vmov 1   ;;  %s191_s9 = sand.u32 1, %s2374_s13  }
  0x14   : > { %2174 = vset.pattern.permute.xlu1 %v2384_v0  ;;  %2173 = vset.pattern.permute.xlu0 %v2384_v0  ;;  %v2387_v60 = vmov 2   ;;  %s2015_s10 = sshll.u32 %s191_s9, 7  ;;  %s2055_s17 = sshll.u32 %s2438_s16, 11 }
  0x15   : > { %s2467_s24 = scalar_select %p194_p10, %s2438_s16, 1  ;;  %v2505_v8 = vshrl.u32 %v372_v5, 7 }
  0x16   : > { %s4013_s11 = scalar_lea.vmem [#allocation2], %s2015_s10  ;;  %s4221_s26 = scalar_lea.sflag [#allocation3], %s191_s9 }
  0x17   : > { %s2052_s25 = sshll.u32 %s2467_s24, 7  ;;  %s2054_s29 = sshll.u32 %s2467_s24, 4  ;;  %v391_v13 = vsub.s32 0, %v2505_v8  ;;  %v387_v15 = vadd.s32 112, %v2505_v8  ;;  %v388_v16 = vadd.s32 120, %v2505_v8  ;;  %v385_v17 = vadd.s32 96, %v2505_v8 }
  0x18   : > { %s2475_s28 = scalar_lea.vmem %s4261_s0, %s2052_s25  ;;  %s2503_s5 = scalar_lea.vmem %s4263_s2, %s2054_s29  ;;  %v386_v20 = vadd.s32 104, %v2505_v8  ;;  %v383_v22 = vadd.s32 80, %v2505_v8  ;;  %v384_v23 = vadd.s32 88, %v2505_v8  ;;  %v381_v28 = vadd.s32 64, %v2505_v8 }
  0x19   : > { %v2478_v1 = vld [vmem:[%s2475_s28 + $0x10] sm:$0xff]  ;;  %v2481_v2 = vld [vmem:[%s2475_s28] sm:$0xff]  ;;  %v2486_v3 = vld [vmem:[%s2475_s28 + $0x18] sm:$0xff]  ;;  %v382_v29 = vadd.s32 72, %v2505_v8  ;;  %v379_v33 = vadd.s32 48, %v2505_v8  ;;  %v380_v34 = vadd.s32 56, %v2505_v8  ;;  %s2648_s8 = scalar_lea.vmem %s4262_s1, %s2052_s25  ;;  %s4214_s25 = scalar_lea.hbm %s4264_s3, %s2055_s17 }
  0x1a   : > { %230 = vmax.xlane.f32.xlu1 %v2478_v1  ;;  %226 = vmax.xlane.f32.xlu0 %v2481_v2  ;;  %v2489_v4 = vld [vmem:[%s2475_s28 + $0x8] sm:$0xff]  ;;  %v2498_v7 = vld [vmem:[%s2475_s28 + $0x20] sm:$0xff]  ;;  %v2510_v9 = vld [vmem:[%s2475_s28 + $0x38] sm:$0xff]  ;;  %v377_v38 = vadd.s32 32, %v2505_v8  ;;  %v378_v39 = vadd.s32 40, %v2505_v8  ;;  %v375_v40 = vadd.s32 16, %v2505_v8 }
  0x1b   : > { %v2495_v6 = vld [vmem:[%s2475_s28 + $0x28] sm:$0xff]  ;;  %v2513_v10 = vld [vmem:[%s2475_s28 + $0x30] sm:$0xff]  ;;  %v2526_v19 = vld [vmem:[%s2475_s28 + $0x40] sm:$0xff]  ;;  %v376_v41 = vadd.s32 24, %v2505_v8  ;;  %v374_v42 = vadd.s32 8, %v2505_v8  ;;  %s1925_s19 = sshll.u32 %s4013_s11, 4  ;;  %s4216_s19 = int_to_ptr.vmem [resolvable:$true] %s1925_s19 }
  0x1c   : > { %v370_v11 = vld [vmem:[%s2503_s5 + $0x9] sm:$0x1]  ;;  %v2539_v24 = vld [vmem:[%s2475_s28 + $0x58] sm:$0xff]  ;;  %v2542_v25 = vld [vmem:[%s2475_s28 + $0x50] sm:$0xff]  ;;  %s2322_s16 = scalar_lea.vmem %s4216_s19, 2048  ;;  %s2394_s27 = smov [#allocation2]  }
  0x1d   : > { %v2120_v12 = vtrunc.f32 %v370_v11  ;;  %v2523_v18 = vld [vmem:[%s2475_s28 + $0x48] sm:$0xff]  ;;  %v2563_v31 = vld [vmem:[%s2475_s28 + $0x60] sm:$0xff]  ;;  %v2588_v35 = vld [vmem:[%s2475_s28 + $0x78] sm:$0xff]  ;;  %p2323_p11 = scmp.ne.s32.totalorder %s4216_s19, %s2322_s16 }
  0x1e   : > { %232 = vmax.xlane.f32.xlu1 %v2486_v3  ;;  %228 = vmax.xlane.f32.xlu0 %v2489_v4  ;;  %v2560_v30 = vld [vmem:[%s2475_s28 + $0x68] sm:$0xff]  ;;  %v2591_v36 = vld [vmem:[%s2475_s28 + $0x70] sm:$0xff]  ;;  %v2666_v45 = vld [vmem:[%s2648_s8] sm:$0xff]  ;;  %s2326_s28 = sshll.u32 %s2394_s27, 4  ;;  %s2327_s28 = int_to_ptr.vmem [resolvable:$false] %s2326_s28 }
  0x1f   : > { %v2121_v14 = vcvt.f32.s32 %v2120_v12  ;;  %v2655_v43 = vld [vmem:[%s2648_s8 + $0x8] sm:$0xff]  ;;  %v2663_v44 = vld [vmem:[%s2648_s8 + $0x10] sm:$0xff]  ;;  %v2673_v46 = vld [vmem:[%s2648_s8 + $0x18] sm:$0xff]  ;;  %p2324_p12 = pnand %p2323_p11, %p2455_p5  ;;  %s2328_s29 = scalar_lea.vmem %s2327_s28, 4096 }
  0x20   : > { %v2676_v47 = vld [vmem:[%s2648_s8 + $0x48] sm:$0xff]  ;;  %v2681_v48 = vld [vmem:[%s2648_s8 + $0x20] sm:$0xff]  ;;  %v2684_v49 = vld [vmem:[%s2648_s8 + $0x58] sm:$0xff]  ;;  %p2329_p0 = scmp.lt.s32.totalorder %s4216_s19, %s2327_s28  ;;  %p2330_p1 = scmp.lt.s32.totalorder %s2328_s29, %s2322_s16 }
  0x21   : > { %v2529_v21 = vrot.slane %v2121_v14, %v391_v13  ;;  %v2689_v50 = vld [vmem:[%s2648_s8 + $0x28] sm:$0xff]  ;;  %v2697_v52 = vld [vmem:[%s2648_s8 + $0x30] sm:$0xff]  ;;  %v2700_v53 = vld [vmem:[%s2648_s8 + $0x78] sm:$0xff]  ;;  %p2325_p13 = pneg %p2324_p12 }
  0x22   : > { %236 = vmax.xlane.f32.xlu1 %v2495_v6  ;;  %234 = vmax.xlane.f32.xlu0 %v2498_v7  ;;  %v2692_v51 = vld [vmem:[%s2648_s8 + $0x68] sm:$0xff]  ;;  %4304 = vst [vmem:[#allocation5_spill] sm:$0xff] %v2697_v52  ;;  %v2705_v54 = vld [vmem:[%s2648_s8 + $0x38] sm:$0xff]  ;;  %v2709_v56 = vld [vmem:[%s2648_s8 + $0x40] sm:$0xff]  ;;  %p2331_p2 = por %p2330_p1, %p2329_p0 }
  0x23   : > { %vm407_vm0 = vcmp.eq.s32.totalorder %v387_v15, %v2529_v21  ;;  %vm408_vm1 = vcmp.eq.s32.totalorder %v388_v16, %v2529_v21  ;;  %vm405_vm2 = vcmp.eq.s32.totalorder %v385_v17, %v2529_v21  ;;  %vm406_vm4 = vcmp.eq.s32.totalorder %v386_v20, %v2529_v21  ;;  %4305 = vst [vmem:[#allocation6_spill] sm:$0xff] %v2709_v56  ;;  %v2714_v57 = vld [vmem:[%s2648_s8 + $0x50] sm:$0xff]  ;;  %v2719_v58 = vld [vmem:[%s2648_s8 + $0x60] sm:$0xff] }
  0x24   : > { %vm2022_vm3 = vmpackc.low %vm408_vm1, %vm407_vm0  ;;  %vm403_vm6 = vcmp.eq.s32.totalorder %v383_v22, %v2529_v21  ;;  %vm404_vm7 = vcmp.eq.s32.totalorder %v384_v23, %v2529_v21  ;;  %vm401_vm9 = vcmp.eq.s32.totalorder %v381_v28, %v2529_v21  ;;  %vm402_vm10 = vcmp.eq.s32.totalorder %v382_v29, %v2529_v21  ;;  %4306 = vst [vmem:[#allocation7_spill] sm:$0xff] %v2714_v57  ;;  %v2724_v59 = vld [vmem:[%s2648_s8 + $0x70] sm:$0xff]  ;;  %p2332_p3 = pnand %p2331_p2, %p2325_p13 }
  0x25   : > { %2072 = vmatprep.subr.msk.bf16.mxu0 %vm2022_vm3, %v2385_v26  ;;  %vm2546_vm5 = vmpackc.low %vm406_vm4, %vm405_vm2  ;;  %2104 = vmatprep.subr.msk.bf16.mxu1 %vm2022_vm3, %v2385_v26  ;;  %vm399_vm12 = vcmp.eq.s32.totalorder %v379_v33, %v2529_v21  ;;  %vm400_vm13 = vcmp.eq.s32.totalorder %v380_v34, %v2529_v21  ;;  %vm397_vm15 = vcmp.eq.s32.totalorder %v377_v38, %v2529_v21 }
  0x26   : > { %240 = vmax.xlane.f32.xlu1 %v2510_v9  ;;  %238 = vmax.xlane.f32.xlu0 %v2513_v10  ;;  %vm2571_vm8 = vmpackc.low %vm404_vm7, %vm403_vm6  ;;  %vm398_vm0 = vcmp.eq.s32.totalorder %v378_v39, %v2529_v21  ;;  %vm395_vm2 = vcmp.eq.s32.totalorder %v375_v40, %v2529_v21  ;;  %vm394_vm6 = vcmp.eq.s32.totalorder %v374_v42, %v2529_v21 }
  0x27   : > { %2073 = vmatpush3.bf16.msk.msra.mxu0 %vm2022_vm3, %v2385_v26  ;;  %2112 = vmatpush3.bf16.msk.msra.mxu1 %vm2022_vm3, %v2385_v26  ;;  %vm2599_vm11 = vmpackc.low %vm402_vm10, %vm401_vm9  ;;  %vm396_vm3 = vcmp.eq.s32.totalorder %v376_v41, %v2529_v21 }
  0x28   : > { %2074 = vmatprep.subr.msk.bf16.mxu0 %vm2546_vm5, %v2385_v26  ;;  %2105 = vmatprep.subr.msk.bf16.mxu1 %vm2546_vm5, %v2385_v26  ;;  %vm2030_vm14 = vmpackc.low %vm400_vm13, %vm399_vm12 }
  0x29   : > { %vm2032_vm1 = vmpackc.low %vm398_vm0, %vm397_vm15 }
  0x2a   : > { %244 = vmax.xlane.f32.xlu1 %v2523_v18  ;;  %242 = vmax.xlane.f32.xlu0 %v2526_v19  ;;  %vm2034_vm4 = vmpackc.low %vm396_vm3, %vm395_vm2 }
  0x2b   : > { %2075 = vmatpush3.bf16.msk.msra.mxu0 %vm2546_vm5, %v2385_v26  ;;  %2113 = vmatpush3.bf16.msk.msra.mxu1 %vm2546_vm5, %v2385_v26  ;;  %vm393_vm5 = vcmp.eq.s32.totalorder %v2505_v8, %v2529_v21 }
  0x2c   : > { %2076 = vmatprep.subr.msk.bf16.mxu0 %vm2571_vm8, %v2385_v26  ;;  %2106 = vmatprep.subr.msk.bf16.mxu1 %vm2571_vm8, %v2385_v26  ;;  %vm2036_vm7 = vmpackc.low %vm394_vm6, %vm393_vm5 }
  0x2e   : > { %248 = vmax.xlane.f32.xlu1 %v2539_v24  ;;  %246 = vmax.xlane.f32.xlu0 %v2542_v25 }
  0x2f   : > { %2077 = vmatpush3.bf16.msk.msra.mxu0 %vm2571_vm8, %v2385_v26  ;;  %2114 = vmatpush3.bf16.msk.msra.mxu1 %vm2571_vm8, %v2385_v26 }
  0x30   : > { %2078 = vmatprep.subr.msk.bf16.mxu0 %vm2599_vm11, %v2385_v26  ;;  %2107 = vmatprep.subr.msk.bf16.mxu1 %vm2599_vm11, %v2385_v26 }
  0x32   : > { %252 = vmax.xlane.f32.xlu1 %v2560_v30  ;;  %250 = vmax.xlane.f32.xlu0 %v2563_v31 }
  0x33   : > { %2079 = vmatpush3.bf16.msk.msra.mxu0 %vm2599_vm11, %v2385_v26  ;;  %2115 = vmatpush3.bf16.msk.msra.mxu1 %vm2599_vm11, %v2385_v26 }
  0x34   : > { %2080 = vmatprep.subr.msk.bf16.mxu0 %vm2030_vm14, %v2385_v26  ;;  %2108 = vmatprep.subr.msk.bf16.mxu1 %vm2030_vm14, %v2385_v26 }
  0x36   : > { %256 = vmax.xlane.f32.xlu1 %v2588_v35  ;;  %254 = vmax.xlane.f32.xlu0 %v2591_v36 }
  0x37   : > { %2081 = vmatpush3.bf16.msk.msra.mxu0 %vm2030_vm14, %v2385_v26  ;;  %2116 = vmatpush3.bf16.msk.msra.mxu1 %vm2030_vm14, %v2385_v26 }
  0x38   : > { %2082 = vmatprep.subr.msk.bf16.mxu0 %vm2032_vm1, %v2385_v26  ;;  %2109 = vmatprep.subr.msk.bf16.mxu1 %vm2032_vm1, %v2385_v26 }
  0x3b   : > { %2083 = vmatpush3.bf16.msk.msra.mxu0 %vm2032_vm1, %v2385_v26  ;;  %2117 = vmatpush3.bf16.msk.msra.mxu1 %vm2032_vm1, %v2385_v26 }
  0x3c   : > { %2084 = vmatprep.subr.msk.bf16.mxu0 %vm2034_vm4, %v2385_v26  ;;  %2110 = vmatprep.subr.msk.bf16.mxu1 %vm2034_vm4, %v2385_v26 }
  0x3f   : > { %2085 = vmatpush3.bf16.msk.msra.mxu0 %vm2034_vm4, %v2385_v26  ;;  %2118 = vmatpush3.bf16.msk.msra.mxu1 %vm2034_vm4, %v2385_v26 }
  0x40   : > { %2086 = vmatprep.subr.msk.bf16.mxu0 %vm2036_vm7, %v2385_v26  ;;  %2111 = vmatprep.subr.msk.bf16.mxu1 %vm2036_vm7, %v2385_v26 }
  0x43   : > { %2087 = vmatpush3.bf16.msk.msra.mxu0 %vm2036_vm7, %v2385_v26  ;;  %2119 = vmatpush3.bf16.msk.msra.mxu1 %vm2036_vm7, %v2385_v26 }
  0x47   : > { %586 = vperm.xlu1 %2174, %v2655_v43  }
  0x4b   : > { %591 = vperm.xlu1 %2174, %v2663_v44  }
  0x4c   : > { %581 = vperm.xlu0 %2173, %v2666_v45  }
  0x4f   : > { %596 = vperm.xlu1 %2174, %v2673_v46  }
  0x50   : > { %626 = vperm.xlu0 %2173, %v2676_v47  }
  0x53   : > { %601 = vperm.xlu1 %2174, %v2681_v48  }
  0x54   : > { %636 = vperm.xlu0 %2173, %v2684_v49  }
  0x57   : > { %606 = vperm.xlu1 %2174, %v2689_v50  }
  0x58   : > { %646 = vperm.xlu0 %2173, %v2692_v51  }
  0x5b   : > { %611 = vperm.xlu1 %2174, %v2697_v52  }
  0x5c   : > { %656 = vperm.xlu0 %2173, %v2700_v53  }
  0x5f   : > { %616 = vperm.xlu1 %2174, %v2705_v54  }
  0x60   : > { %2176 = vset.pattern.permute.xlu0 %v2386_v55 }
  0x61   : > { %700 = vperm.xlu0 %2176, %v2655_v43  }
  0x63   : > { %621 = vperm.xlu1 %2174, %v2709_v56  }
  0x65   : > { %712 = vperm.xlu0 %2176, %v2681_v48  }
  0x67   : > { %631 = vperm.xlu1 %2174, %v2714_v57  }
  0x69   : > { %720 = vperm.xlu0 %2176, %v2697_v52  }
  0x6b   : > { %641 = vperm.xlu1 %2174, %v2719_v58  }
  0x6d   : > { %728 = vperm.xlu0 %2176, %v2709_v56  }
  0x6f   : > { %651 = vperm.xlu1 %2174, %v2724_v59  }
  0x71   : > { %736 = vperm.xlu0 %2176, %v2714_v57  }
  0x73   : > { %2175 = vset.pattern.permute.xlu1 %v2386_v55 }
  0x74   : > { %696 = vperm.xlu1 %2175, %v2666_v45  }
  0x75   : > { %744 = vperm.xlu0 %2176, %v2719_v58  }
  0x78   : > { %704 = vperm.xlu1 %2175, %v2663_v44  }
  0x79   : > { %752 = vperm.xlu0 %2176, %v2724_v59  }
  0x7c   : > { %708 = vperm.xlu1 %2175, %v2673_v46  }
  0x7d   : > { %2177 = vset.pattern.permute.xlu0 %v2387_v60 }
  0x7e   : > { %812 = vperm.xlu0 %2177, %v2666_v45  }
  0x80   : > { %716 = vperm.xlu1 %2175, %v2689_v50  }
  0x84   : > { %724 = vperm.xlu1 %2175, %v2705_v54  }
  0x88   : > { %732 = vperm.xlu1 %2175, %v2676_v47  }
  0x8c   : > { %740 = vperm.xlu1 %2175, %v2684_v49  }
  0x90   : > { %748 = vperm.xlu1 %2175, %v2692_v51  }
  0x94   : > { %756 = vperm.xlu1 %2175, %v2700_v53  }
  0x98   : > { %2178 = vset.pattern.permute.xlu1 %v2387_v60 }
  0x99   : > { %816 = vperm.xlu1 %2178, %v2655_v43  }
  0x9d   : > { %820 = vperm.xlu1 %2178, %v2663_v44  }
  0xa3   : > { %v231_v61 = vpop.xlane.xlu1 %230  ;;  %v227_v62 = vpop.xlane.xlu0 %226 }
  0xa4   : > { %v260_v63 = vsub.f32 %v2478_v1, %v231_v61  ;;  %v258_v0 = vsub.f32 %v2481_v2, %v227_v62 }
  0xa6   : > { %v274_v5 = vmul.f32 1.442695, %v258_v0  ;;  %v278_v8 = vmul.f32 1.442695, %v260_v63 }
  0xa7   : > { %v233_v11 = vpop.xlane.xlu1 %232  ;;  %v229_v12 = vpop.xlane.xlu0 %228 }
  0xa8   : > { %v261_v13 = vsub.f32 %v2486_v3, %v233_v11  ;;  %v259_v14 = vsub.f32 %v2489_v4, %v229_v12  ;;  %2191 = vpow2.f32 %v274_v5 }
  0xa9   : > { %2193 = vpow2.f32 %v278_v8 }
  0xaa   : > { %v280_v15 = vmul.f32 1.442695, %v261_v13  ;;  %v276_v16 = vmul.f32 1.442695, %v259_v14 }
  0xab   : > { %v237_v17 = vpop.xlane.xlu1 %236  ;;  %v235_v20 = vpop.xlane.xlu0 %234 }
  0xac   : > { %2195 = vpow2.f32 %v280_v15  ;;  %v263_v21 = vsub.f32 %v2495_v6, %v237_v17  ;;  %v262_v1 = vsub.f32 %v2498_v7, %v235_v20 }
  0xad   : > { %2197 = vpow2.f32 %v276_v16 }
  0xae   : > { %v284_v2 = vmul.f32 1.442695, %v263_v21  ;;  %v282_v22 = vmul.f32 1.442695, %v262_v1 }
  0xaf   : > { %v241_v23 = vpop.xlane.xlu1 %240  ;;  %v239_v26 = vpop.xlane.xlu0 %238 }
  0xb0   : > { %2199 = vpow2.f32 %v284_v2  ;;  %v265_v3 = vsub.f32 %v2510_v9, %v241_v23  ;;  %v264_v4 = vsub.f32 %v2513_v10, %v239_v26 }
  0xb1   : > { %2201 = vpow2.f32 %v282_v22 }
  0xb2   : > { %v288_v27 = vmul.f32 1.442695, %v265_v3  ;;  %v286_v28 = vmul.f32 1.442695, %v264_v4 }
  0xb3   : > { %v245_v29 = vpop.xlane.xlu1 %244  ;;  %v243_v32 = vpop.xlane.xlu0 %242 }
  0xb4   : > { %2203 = vpow2.f32 %v288_v27  ;;  %v267_v6 = vsub.f32 %v2523_v18, %v245_v29  ;;  %v266_v7 = vsub.f32 %v2526_v19, %v243_v32 }
  0xb5   : > { %2205 = vpow2.f32 %v286_v28  ;;  %v2192_v33 = vpop.eup %2191 }
  0xb6   : > { %v292_v34 = vmul.f32 1.442695, %v267_v6  ;;  %v290_v37 = vmul.f32 1.442695, %v266_v7  ;;  %306 = vadd.xlane.f32.xlu0 %v2192_v33  ;;  %v2194_v9 = vpop.eup %2193 }
  0xb7   : > { %v249_v38 = vpop.xlane.xlu1 %248  ;;  %v247_v39 = vpop.xlane.xlu0 %246 }
  0xb8   : > { %2207 = vpow2.f32 %v292_v34  ;;  %v269_v10 = vsub.f32 %v2539_v24, %v249_v38  ;;  %v268_v40 = vsub.f32 %v2542_v25, %v247_v39 }
  0xb9   : > { %v2196_v41 = vpop.eup %2195  ;;  %2209 = vpow2.f32 %v290_v37 }
  0xba   : > { %v2198_v42 = vpop.eup %2197  ;;  %v296_v55 = vmul.f32 1.442695, %v269_v10  ;;  %v294_v18 = vmul.f32 1.442695, %v268_v40  ;;  %v434_v60 = vpack.c.bf16 %v2196_v41, %v2194_v9  ;;  %310 = vadd.xlane.f32.xlu0 %v2194_v9 }
  0xbb   : > { %v253_v19 = vpop.xlane.xlu1 %252  ;;  %v251_v61 = vpop.xlane.xlu0 %250  ;;  %v433_v62 = vpack.c.bf16 %v2198_v42, %v2192_v33 }
  0xbc   : > { %2211 = vpow2.f32 %v296_v55  ;;  %v271_v63 = vsub.f32 %v2560_v30, %v253_v19  ;;  %v270_v0 = vsub.f32 %v2563_v31, %v251_v61  ;;  %v2388_v55 = vmov 3  }
  0xbd   : > { %v2200_v5 = vpop.eup %2199  ;;  %2213 = vpow2.f32 %v294_v18  ;;  %2088 = vmatprep.mubr.bf16.mxu0 %v433_v62 }
  0xbe   : > { %v2202_v24 = vpop.eup %2201  ;;  %v300_v25 = vmul.f32 1.442695, %v271_v63  ;;  %v298_v8 = vmul.f32 1.442695, %v270_v0  ;;  %2089 = vmatmul.mubr.bf16.vlgmr.msra.gmra.mxu0 %v434_v60 }
  0xbf   : > { %314 = vadd.xlane.f32.xlu0 %v2202_v24  ;;  %v257_v11 = vpop.xlane.xlu1 %256  ;;  %v255_v12 = vpop.xlane.xlu0 %254  ;;  %v435_v13 = vpack.c.bf16 %v2200_v5, %v2202_v24 }
  0xc0   : > { %2215 = vpow2.f32 %v300_v25  ;;  %v273_v14 = vsub.f32 %v2588_v35, %v257_v11  ;;  %v272_v15 = vsub.f32 %v2591_v36, %v255_v12 }
  0xc1   : > { %v2204_v16 = vpop.eup %2203  ;;  %2217 = vpow2.f32 %v298_v8  ;;  %2092 = vmatprep.mubr.bf16.mxu0 %v435_v13  ;;  %308 = vadd.xlane.f32.xlu1 %v2198_v42  ;;  %v2389_v8 = vmov 4  }
  0xc2   : > { %v2206_v30 = vpop.eup %2205  ;;  %v304_v31 = vmul.f32 1.442695, %v273_v14  ;;  %v302_v17 = vmul.f32 1.442695, %v272_v15 }
  0xc3   : > { %318 = vadd.xlane.f32.xlu0 %v2206_v30  ;;  %v436_v20 = vpack.c.bf16 %v2204_v16, %v2206_v30  ;;  %v2759_v35 = vpop.permute.xlu1 %586 }
  0xc4   : > { %2219 = vpow2.f32 %v304_v31 }
  0xc5   : > { %v2208_v21 = vpop.eup %2207  ;;  %2221 = vpow2.f32 %v302_v17  ;;  %312 = vadd.xlane.f32.xlu1 %v2196_v41 }
  0xc6   : > { %v2210_v1 = vpop.eup %2209  ;;  %2093 = vmatmul.mubr.bf16.gmra.mxu0 %v436_v20 }
  0xc7   : > { %322 = vadd.xlane.f32.xlu0 %v2210_v1  ;;  %v437_v2 = vpack.c.bf16 %v2208_v21, %v2210_v1  ;;  %v2761_v4 = vpop.permute.xlu1 %591  ;;  %v2780_v39 = vpop.permute.xlu0 %581  ;;  %v2390_v1 = vmov 5  }
  0xc9   : > { %v2212_v36 = vpop.eup %2211  ;;  %2096 = vmatprep.mubr.bf16.mxu1 %v437_v2  ;;  %316 = vadd.xlane.f32.xlu1 %v2200_v5 }
  0xca   : > { %v2214_v22 = vpop.eup %2213 }
  0xcb   : > { %326 = vadd.xlane.f32.xlu0 %v2214_v22  ;;  %v438_v23 = vpack.c.bf16 %v2212_v36, %v2214_v22  ;;  %v2763_v6 = vpop.permute.xlu1 %596  ;;  %v2787_v10 = vpop.permute.xlu0 %626 }
  0xcd   : > { %v2216_v26 = vpop.eup %2215  ;;  %2097 = vmatmul.mubr.bf16.vlgmr.msra.gmra.mxu1 %v438_v23  ;;  %320 = vadd.xlane.f32.xlu1 %v2204_v16 }
  0xce   : > { %v2218_v3 = vpop.eup %2217 }
  0xcf   : > { %330 = vadd.xlane.f32.xlu0 %v2218_v3  ;;  %v439_v27 = vpack.c.bf16 %v2216_v26, %v2218_v3  ;;  %v2765_v7 = vpop.permute.xlu1 %601  ;;  %v2794_v41 = vpop.permute.xlu0 %636 }
  0xd1   : > { %v2220_v28 = vpop.eup %2219  ;;  %2100 = vmatprep.mubr.bf16.mxu1 %v439_v27  ;;  %324 = vadd.xlane.f32.xlu1 %v2208_v21 }
  0xd2   : > { %v2222_v29 = vpop.eup %2221 }
  0xd3   : > { %334 = vadd.xlane.f32.xlu0 %v2222_v29  ;;  %v440_v32 = vpack.c.bf16 %v2220_v28, %v2222_v29  ;;  %v2767_v33 = vpop.permute.xlu1 %606  ;;  %v2800_v18 = vpop.permute.xlu0 %646 }
  0xd5   : > { %2101 = vmatmul.mubr.bf16.gmra.mxu1 %v440_v32  ;;  %328 = vadd.xlane.f32.xlu1 %v2212_v36 }
  0xd7   : > { %v2769_v34 = vpop.permute.xlu1 %611  ;;  %v2808_v19 = vpop.permute.xlu0 %656 }
  0xd9   : > { %332 = vadd.xlane.f32.xlu1 %v2216_v26 }
  0xdb   : > { %v2772_v37 = vpop.permute.xlu1 %616 }
  0xdc   : > { %v2814_v62 = vpop.permute.xlu0 %700 }
  0xdd   : > { %336 = vadd.xlane.f32.xlu1 %v2220_v28 }
  0xdf   : > { %v2777_v38 = vpop.permute.xlu1 %621 }
  0xe0   : > { %v2822_v0 = vpop.permute.xlu0 %712 }
  0xe3   : > { %v2784_v9 = vpop.permute.xlu1 %631 }
  0xe4   : > { %v2828_v24 = vpop.permute.xlu0 %720 }
  0xe7   : > { %v2791_v40 = vpop.permute.xlu1 %641 }
  0xe8   : > { %v2836_v11 = vpop.permute.xlu0 %728 }
  0xe9   : > { %824 = vperm.xlu0 %2177, %v2673_v46  }
  0xeb   : > { %v2798_v42 = vpop.permute.xlu1 %651 }
  0xec   : > { %4307 = vst [vmem:[#allocation8_spill] sm:$0xff] %v2798_v42  ;;  %v2842_v13 = vpop.permute.xlu0 %736 }
  0xed   : > { %832 = vperm.xlu0 %2177, %v2689_v50  }
  0xee   : > { %828 = vperm.xlu1 %2178, %v2681_v48  }
  0xef   : > { %v2804_v60 = vpop.permute.xlu1 %696 }
  0xf0   : > { %v2849_v15 = vpop.permute.xlu0 %744 }
  0xf1   : > { %840 = vperm.xlu0 %2177, %v2705_v54  }
  0xf2   : > { %836 = vperm.xlu1 %2178, %v2697_v52  }
  0xf3   : > { %v2812_v61 = vpop.permute.xlu1 %704 }
  0xf4   : > { %v2856_v30 = vpop.permute.xlu0 %752 }
  0xf5   : > { %848 = vperm.xlu0 %2177, %v2676_v47   ;;  %4308 = vst [vmem:[#allocation9_spill] sm:$0xff] %v2856_v30 }
  0xf6   : > { %844 = vperm.xlu1 %2178, %v2709_v56  }
  0xf7   : > { %v2818_v63 = vpop.permute.xlu1 %708 }
  0xf9   : > { %856 = vperm.xlu0 %2177, %v2684_v49   ;;  %v2863_v17 = vpop.permute.xlu0 %812 }
  0xfa   : > { %852 = vperm.xlu1 %2178, %v2714_v57  }
  0xfb   : > { %v2826_v5 = vpop.permute.xlu1 %716 }
  0xfd   : > { %864 = vperm.xlu0 %2177, %v2692_v51  }
  0xfe   : > { %860 = vperm.xlu1 %2178, %v2719_v58  }
  0xff   : > { %v2832_v25 = vpop.permute.xlu1 %724 }
 0x101   : > { %872 = vperm.xlu0 %2177, %v2700_v53  }
 0x102   : > { %868 = vperm.xlu1 %2178, %v2724_v59  }
 0x103   : > { %v2840_v12 = vpop.permute.xlu1 %732 }
 0x105   : > { %2180 = vset.pattern.permute.xlu0 %v2388_v55 }
 0x106   : > { %932 = vperm.xlu0 %2180, %v2655_v43   ;;  %2179 = vset.pattern.permute.xlu1 %v2388_v55 }
 0x107   : > { %928 = vperm.xlu1 %2179, %v2666_v45   ;;  %v2846_v14 = vpop.permute.xlu1 %740 }
 0x10a   : > { %944 = vperm.xlu0 %2180, %v2681_v48  }
 0x10b   : > { %936 = vperm.xlu1 %2179, %v2663_v44   ;;  %v2853_v16 = vpop.permute.xlu1 %748 }
 0x10e   : > { %952 = vperm.xlu0 %2180, %v2697_v52  }
 0x10f   : > { %940 = vperm.xlu1 %2179, %v2673_v46   ;;  %v2860_v31 = vpop.permute.xlu1 %756 }
 0x112   : > { %960 = vperm.xlu0 %2180, %v2709_v56  }
 0x113   : > { %948 = vperm.xlu1 %2179, %v2689_v50  }
 0x114   : > { %v2867_v20 = vpop.permute.xlu1 %816 }
 0x116   : > { %968 = vperm.xlu0 %2180, %v2714_v57  }
 0x117   : > { %956 = vperm.xlu1 %2179, %v2705_v54  }
 0x118   : > { %v2876_v36 = vpop.permute.xlu1 %820 }
 0x119   : > { %4311 = vst [vmem:[#allocation12_spill] sm:$0xff] %v2876_v36 }
 0x11a   : > { %976 = vperm.xlu0 %2180, %v2719_v58  }
 0x11b   : > { %964 = vperm.xlu1 %2179, %v2676_v47  }
 0x11e   : > { %984 = vperm.xlu0 %2180, %v2724_v59  }
 0x11f   : > { %972 = vperm.xlu1 %2179, %v2684_v49  }
 0x122   : > { %2181 = vset.pattern.permute.xlu0 %v2389_v8 }
 0x123   : > { %1044 = vperm.xlu0 %2181, %v2666_v45   ;;  %980 = vperm.xlu1 %2179, %v2692_v51  }
 0x127   : > { %1056 = vperm.xlu0 %2181, %v2673_v46   ;;  %988 = vperm.xlu1 %2179, %v2700_v53  }
 0x12b   : > { %1064 = vperm.xlu0 %2181, %v2689_v50   ;;  %2182 = vset.pattern.permute.xlu1 %v2389_v8 }
 0x12c   : > { %1048 = vperm.xlu1 %2182, %v2655_v43  }
 0x12f   : > { %1072 = vperm.xlu0 %2181, %v2705_v54  }
 0x130   : > { %1052 = vperm.xlu1 %2182, %v2663_v44  }
 0x133   : > { %1080 = vperm.xlu0 %2181, %v2676_v47  }
 0x134   : > { %1060 = vperm.xlu1 %2182, %v2681_v48  }
 0x137   : > { %1088 = vperm.xlu0 %2181, %v2684_v49  }
 0x138   : > { %1068 = vperm.xlu1 %2182, %v2697_v52  }
 0x13b   : > { %1096 = vperm.xlu0 %2181, %v2692_v51  }
 0x13c   : > { %1076 = vperm.xlu1 %2182, %v2709_v56  }
 0x13f   : > { %1104 = vperm.xlu0 %2181, %v2700_v53   ;;  %v2869_v21 = vpop.xlane.xlu0 %306 }
 0x140   : > { %4309 = vst [vmem:[#allocation10_spill] sm:$0xff] %v2869_v21  ;;  %1084 = vperm.xlu1 %2182, %v2714_v57   ;;  %v3008_v21 = vld [vmem:[%s2503_s5 + $0x3] ss:$0 sm:$0xff] }
 0x143   : > { %2184 = vset.pattern.permute.xlu0 %v2390_v1  ;;  %v2873_v2 = vpop.xlane.xlu0 %310 }
 0x144   : > { %1132 = vperm.xlu0 %2184, %v2655_v43   ;;  %4310 = vst [vmem:[#allocation11_spill] sm:$0xff] %v2873_v2  ;;  %1092 = vperm.xlu1 %2182, %v2719_v58  }
 0x148   : > { %1144 = vperm.xlu0 %2184, %v2681_v48   ;;  %1100 = vperm.xlu1 %2182, %v2724_v59   ;;  %v2880_v22 = vpop.xlane.xlu0 %314 }
 0x149   : > { %4312 = vst [vmem:[#allocation13_spill] sm:$0xff] %v2880_v22 }
 0x14a   : > { %v2882_v23 = vpop.xlane.xlu1 %308 }
 0x14b   : > { %4313 = vst [vmem:[#allocation14_spill] sm:$0xff] %v2882_v23 }
 0x14c   : > { %1152 = vperm.xlu0 %2184, %v2697_v52   ;;  %2183 = vset.pattern.permute.xlu1 %v2390_v1  ;;  %v2885_v26 = vpop.xlane.xlu0 %318 }
 0x14d   : > { %4314 = vst [vmem:[#allocation15_spill] sm:$0xff] %v2885_v26  ;;  %1128 = vperm.xlu1 %2183, %v2666_v45  }
 0x14e   : > { %v2888_v3 = vpop.xlane.xlu1 %312 }
 0x14f   : > { %4315 = vst [vmem:[#allocation16_spill] sm:$0xff] %v2888_v3  ;;  %v2392_v3 = vmov 7  }
 0x150   : > { %1160 = vperm.xlu0 %2184, %v2709_v56   ;;  %v2891_v27 = vpop.xlane.xlu0 %322 }
 0x151   : > { %4316 = vst [vmem:[#allocation17_spill] sm:$0xff] %v2891_v27  ;;  %1136 = vperm.xlu1 %2183, %v2663_v44  }
 0x152   : > { %v2894_v28 = vpop.xlane.xlu1 %316 }
 0x153   : > { %4317 = vst [vmem:[#allocation18_spill] sm:$0xff] %v2894_v28 }
 0x154   : > { %1168 = vperm.xlu0 %2184, %v2714_v57   ;;  %v2897_v29 = vpop.xlane.xlu0 %326 }
 0x155   : > { %4318 = vst [vmem:[#allocation19_spill] sm:$0xff] %v2897_v29  ;;  %1140 = vperm.xlu1 %2183, %v2673_v46   ;;  %v2391_v29 = vmov 6  }
 0x156   : > { %v2900_v32 = vpop.xlane.xlu1 %320 }
 0x157   : > { %4319 = vst [vmem:[#allocation20_spill] sm:$0xff] %v2900_v32 }
 0x158   : > { %1176 = vperm.xlu0 %2184, %v2719_v58   ;;  %v2903_v55 = vpop.xlane.xlu0 %330 }
 0x159   : > { %4320 = vst [vmem:[#allocation21_spill] sm:$0xff] %v2903_v55  ;;  %1148 = vperm.xlu1 %2183, %v2689_v50  }
 0x15a   : > { %v2906_v8 = vpop.xlane.xlu1 %324 }
 0x15b   : > { %4321 = vst [vmem:[#allocation22_spill] sm:$0xff] %v2906_v8 }
 0x15c   : > { %1184 = vperm.xlu0 %2184, %v2724_v59   ;;  %v2912_v28 = vpop.xlane.xlu0 %334 }
 0x15d   : > { %1156 = vperm.xlu1 %2183, %v2705_v54   ;;  %4323 = vst [vmem:[#allocation24_spill] sm:$0xff] %v2912_v28 }
 0x15e   : > { %v2910_v1 = vpop.xlane.xlu1 %328 }
 0x15f   : > { %4322 = vst [vmem:[#allocation23_spill] sm:$0xff] %v2910_v1 }
 0x160   : > { %2185 = vset.pattern.permute.xlu0 %v2391_v29 }
 0x161   : > { %1212 = vperm.xlu0 %2185, %v2666_v45   ;;  %1164 = vperm.xlu1 %2183, %v2676_v47  }
 0x162   : > { %v2916_v32 = vpop.xlane.xlu1 %332 }
 0x163   : > { %4324 = vst [vmem:[#allocation25_spill] sm:$0xff] %v2916_v32 }
 0x164   : > { %v2918_v55 = vpop.permute.xlu0 %824 }
 0x165   : > { %4325 = vst [vmem:[#allocation26_spill] sm:$0xff] %v2918_v55  ;;  %1224 = vperm.xlu0 %2185, %v2673_v46   ;;  %1172 = vperm.xlu1 %2183, %v2684_v49  }
 0x166   : > { %v2922_v8 = vpop.xlane.xlu1 %336 }
 0x167   : > { %4326 = vst [vmem:[#allocation27_spill] sm:$0xff] %v2922_v8 }
 0x168   : > { %v2924_v27 = vpop.permute.xlu0 %832 }
 0x169   : > { %4327 = vst [vmem:[#allocation28_spill] sm:$0xff] %v2924_v27  ;;  %1232 = vperm.xlu0 %2185, %v2689_v50   ;;  %1180 = vperm.xlu1 %2183, %v2692_v51  }
 0x16a   : > { %v2928_v28 = vpop.permute.xlu1 %828 }
 0x16b   : > { %4328 = vst [vmem:[#allocation29_spill] sm:$0xff] %v2928_v28 }
 0x16c   : > { %v2930_v1 = vpop.permute.xlu0 %840 }
 0x16d   : > { %4329 = vst [vmem:[#allocation30_spill] sm:$0xff] %v2930_v1  ;;  %1240 = vperm.xlu0 %2185, %v2705_v54   ;;  %1188 = vperm.xlu1 %2183, %v2700_v53  }
 0x16e   : > { %v2934_v32 = vpop.permute.xlu1 %836 }
 0x16f   : > { %4330 = vst [vmem:[#allocation31_spill] sm:$0xff] %v2934_v32 }
 0x170   : > { %v849_v55 = vpop.permute.xlu0 %848 }
 0x171   : > { %1248 = vperm.xlu0 %2185, %v2676_v47   ;;  %2186 = vset.pattern.permute.xlu1 %v2391_v29 }
 0x172   : > { %1216 = vperm.xlu1 %2186, %v2655_v43   ;;  %v2938_v8 = vpop.permute.xlu1 %844 }
 0x173   : > { %4331 = vst [vmem:[#allocation32_spill] sm:$0xff] %v2938_v8 }
 0x174   : > { %v857_v27 = vpop.permute.xlu0 %856 }
 0x175   : > { %1256 = vperm.xlu0 %2185, %v2684_v49  }
 0x176   : > { %1220 = vperm.xlu1 %2186, %v2663_v44   ;;  %v2942_v28 = vpop.permute.xlu1 %852 }
 0x177   : > { %4332 = vst [vmem:[#allocation33_spill] sm:$0xff] %v2942_v28 }
 0x178   : > { %v2944_v1 = vpop.permute.xlu0 %864 }
 0x179   : > { %1264 = vperm.xlu0 %2185, %v2692_v51  }
 0x17a   : > { %1228 = vperm.xlu1 %2186, %v2681_v48   ;;  %v2948_v32 = vpop.permute.xlu1 %860 }
 0x17b   : > { %4333 = vst [vmem:[#allocation34_spill] sm:$0xff] %v2948_v32 }
 0x17c   : > { %v2950_v29 = vpop.permute.xlu0 %872 }
 0x17d   : > { %1272 = vperm.xlu0 %2185, %v2700_v53  }
 0x17e   : > { %1236 = vperm.xlu1 %2186, %v2697_v52   ;;  %v2954_v8 = vpop.permute.xlu1 %868 }
 0x17f   : > { %4334 = vst [vmem:[#allocation35_spill] sm:$0xff] %v2954_v8 }
 0x181   : > { %2188 = vset.pattern.permute.xlu0 %v2392_v3  ;;  %v2956_v28 = vpop.permute.xlu0 %932 }
 0x182   : > { %4335 = vst [vmem:[#allocation36_spill] sm:$0xff] %v2956_v28  ;;  %1300 = vperm.xlu0 %2188, %v2655_v43   ;;  %1244 = vperm.xlu1 %2186, %v2709_v56   ;;  %v2960_v36 = vpop.permute.xlu1 %928 }
 0x183   : > { %4336 = vst [vmem:[#allocation37_spill] sm:$0xff] %v2960_v36  ;;  %v2977_v36 = vld [vmem:[%s2503_s5 + $0x1] ss:$0 sm:$0xff] }
 0x184   : > { %4342 = vst [vmem:[#allocation43_spill] sm:$0xff] %v2977_v36  ;;  %v772_v23 = vsub.f32 %v2840_v12, %v2977_v36 }
 0x185   : > { %v2962_v32 = vpop.permute.xlu0 %944 }
 0x186   : > { %4337 = vst [vmem:[#allocation38_spill] sm:$0xff] %v2962_v32  ;;  %1312 = vperm.xlu0 %2188, %v2681_v48   ;;  %1252 = vperm.xlu1 %2186, %v2714_v57   ;;  %v2966_v8 = vpop.permute.xlu1 %936 }
 0x187   : > { %4338 = vst [vmem:[#allocation39_spill] sm:$0xff] %v2966_v8  ;;  %v2989_v8 = vld [vmem:[%s2503_s5 + $0x2] ss:$0 sm:$0xff] }
 0x188   : > { %4345 = vst [vmem:[#allocation46_spill] sm:$0xff] %v2989_v8 }
 0x189   : > { %v2968_v30 = vpop.permute.xlu0 %952 }
 0x18a   : > { %4339 = vst [vmem:[#allocation40_spill] sm:$0xff] %v2968_v30  ;;  %1320 = vperm.xlu0 %2188, %v2697_v52   ;;  %1260 = vperm.xlu1 %2186, %v2719_v58   ;;  %v2972_v28 = vpop.permute.xlu1 %940  ;;  %v2986_v30 = vld [vmem:[%s2503_s5] ss:$0 sm:$0xff] }
 0x18b   : > { %4340 = vst [vmem:[#allocation41_spill] sm:$0xff] %v2972_v28  ;;  %4344 = vst [vmem:[#allocation45_spill] sm:$0xff] %v2986_v30  ;;  %v672_v28 = vsub.f32 %v2787_v10, %v2986_v30  ;;  %v674_v2 = vsub.f32 %v2794_v41, %v2986_v30  ;;  %v776_v41 = vsub.f32 %v2853_v16, %v2977_v36 }
 0x18d   : > { %v2974_v26 = vpop.permute.xlu0 %960  ;;  %v688_v42 = vand.u32 2147483647, %v672_v28 }
 0x18e   : > { %4341 = vst [vmem:[#allocation42_spill] sm:$0xff] %v2974_v26  ;;  %1328 = vperm.xlu0 %2188, %v2709_v56   ;;  %v2980_v32 = vpop.permute.xlu1 %948  ;;  %1268 = vperm.xlu1 %2186, %v2724_v59   ;;  %v888_v26 = vsub.f32 %v849_v55, %v2989_v8  ;;  %v788_v56 = vand.u32 2147483647, %v772_v23  ;;  %v890_v55 = vsub.f32 %v857_v27, %v2989_v8 }
 0x18f   : > { %4343 = vst [vmem:[#allocation44_spill] sm:$0xff] %v2980_v32  ;;  %v774_v32 = vsub.f32 %v2846_v14, %v2977_v36 }
 0x190   : > { %v904_v10 = vand.u32 2147483647, %v888_v26  ;;  %v906_v28 = vand.u32 2147483647, %v890_v55 }
 0x191   : > { %v2994_v22 = vpop.permute.xlu0 %968 }
 0x192   : > { %4346 = vst [vmem:[#allocation47_spill] sm:$0xff] %v2994_v22  ;;  %1336 = vperm.xlu0 %2188, %v2714_v57   ;;  %v2999_v12 = vpop.permute.xlu1 %956  ;;  %2187 = vset.pattern.permute.xlu1 %v2392_v3  ;;  %v790_v22 = vand.u32 2147483647, %v774_v32  ;;  %v690_v3 = vand.u32 2147483647, %v674_v2  ;;  %v676_v32 = vsub.f32 %v2800_v18, %v2986_v30  ;;  %v678_v18 = vsub.f32 %v2808_v19, %v2986_v30 }
 0x193   : > { %4347 = vst [vmem:[#allocation48_spill] sm:$0xff] %v2999_v12  ;;  %1296 = vperm.xlu1 %2187, %v2666_v45   ;;  %v804_v12 = vadd.f32 %v788_v56, %v688_v42  ;;  %v892_v56 = vsub.f32 %v2944_v1, %v2989_v8  ;;  %v778_v42 = vsub.f32 %v2860_v31, %v2977_v36 }
 0x194   : > { %v894_v1 = vsub.f32 %v2950_v29, %v2989_v8 }
 0x195   : > { %v3005_v52 = vpop.permute.xlu0 %976  ;;  %v920_v26 = vadd.f32 %v904_v10, %v804_v12  ;;  %v792_v12 = vand.u32 2147483647, %v776_v41  ;;  %v908_v55 = vand.u32 2147483647, %v892_v56 }
 0x196   : > { %4348 = vst [vmem:[#allocation49_spill] sm:$0xff] %v3005_v52  ;;  %1344 = vperm.xlu0 %2188, %v2719_v58   ;;  %v965_v14 = vpop.permute.xlu1 %964  ;;  %v806_v52 = vadd.f32 %v790_v22, %v690_v3  ;;  %v794_v3 = vand.u32 2147483647, %v778_v42  ;;  %v910_v29 = vand.u32 2147483647, %v894_v1 }
 0x197   : > { %v1004_v23 = vsub.f32 %v965_v14, %v3008_v21  ;;  %1304 = vperm.xlu1 %2187, %v2663_v44   ;;  %v2393_v14 = vmov 8  }
 0x198   : > { %v922_v22 = vadd.f32 %v906_v28, %v806_v52  ;;  %v694_v52 = vand.u32 2147483647, %v678_v18 }
 0x199   : > { %v1020_v27 = vand.u32 2147483647, %v1004_v23  ;;  %v3015_v57 = vpop.permute.xlu0 %984 }
 0x19a   : > { %4349 = vst [vmem:[#allocation50_spill] sm:$0xff] %v3015_v57  ;;  %1352 = vperm.xlu0 %2188, %v2724_v59   ;;  %v973_v58 = vpop.permute.xlu1 %972  ;;  %v692_v59 = vand.u32 2147483647, %v676_v32 }
 0x19b   : > { %v3024_v16 = vadd.f32 %v1020_v27, %v920_v26  ;;  %v1006_v2 = vsub.f32 %v973_v58, %v3008_v21  ;;  %1308 = vperm.xlu1 %2187, %v2673_v46   ;;  %v810_v58 = vadd.f32 %v794_v3, %v694_v52 }
 0x19c   : > { %v808_v41 = vadd.f32 %v792_v12, %v692_v59 }
 0x19d   : > { %v1022_v10 = vand.u32 2147483647, %v1006_v2 }
 0x19e   : > { %2189 = vset.pattern.permute.xlu0 %v2393_v14  ;;  %v3032_v31 = vpop.permute.xlu0 %1044  ;;  %v981_v23 = vpop.permute.xlu1 %980  ;;  %v924_v28 = vadd.f32 %v908_v55, %v808_v41  ;;  %v665_v41 = vsub.f32 %v2761_v4, %v2986_v30  ;;  %v668_v4 = vsub.f32 %v2767_v33, %v2986_v30 }
 0x19f   : > { %v3034_v26 = vadd.f32 %v1022_v10, %v922_v22  ;;  %1460 = vperm.xlu0 %2189, %v2666_v45   ;;  %v1008_v19 = vsub.f32 %v981_v23, %v3008_v21  ;;  %1316 = vperm.xlu1 %2187, %v2689_v50   ;;  %v926_v45 = vadd.f32 %v910_v29, %v810_v58 }
 0x1a0   : > { %v3112_v58 = vand.u32 2147483647, %v668_v4 }
 0x1a1   : > { %v1024_v27 = vand.u32 2147483647, %v1008_v19  ;;  %v663_v19 = vsub.f32 %v2780_v39, %v2986_v30  ;;  %v669_v39 = vsub.f32 %v2769_v34, %v2986_v30 }
 0x1a2   : > { %v3039_v32 = vpop.permute.xlu0 %1056  ;;  %v989_v56 = vpop.permute.xlu1 %988 }
 0x1a3   : > { %v1010_v2 = vsub.f32 %v989_v56, %v3008_v21  ;;  %1472 = vperm.xlu0 %2189, %v2673_v46   ;;  %v3043_v42 = vadd.f32 %v1024_v27, %v924_v28  ;;  %1324 = vperm.xlu1 %2187, %v2705_v54   ;;  %v679_v33 = vand.u32 2147483647, %v663_v19  ;;  %v3110_v56 = vpop.f32.mrf.mxu0 }
 0x1a5   : > { %4350 = vst [vmem:[#allocation51_spill] sm:$0xff] %v3043_v42  ;;  %v1026_v12 = vand.u32 2147483647, %v1010_v2 }
 0x1a6   : > { %v3046_v22 = vpop.permute.xlu0 %1064 }
 0x1a7   : > { %v3048_v18 = vadd.f32 %v1026_v12, %v926_v45  ;;  %1480 = vperm.xlu0 %2189, %v2689_v50   ;;  %v3051_v1 = vpop.permute.xlu1 %1048  ;;  %1332 = vperm.xlu1 %2187, %v2676_v47   ;;  %v685_v45 = vand.u32 2147483647, %v669_v39 }
 0x1a9   : > { %4351 = vst [vmem:[#allocation52_spill] sm:$0xff] %v3048_v18  ;;  %v4395_v18 = vld [vmem:[#allocation19_spill] sm:$0xff] }
 0x1aa   : > { %v3054_v10 = vpop.permute.xlu0 %1072 }
 0x1ab   : > { %1488 = vperm.xlu0 %2189, %v2705_v54   ;;  %v3057_v46 = vpop.permute.xlu1 %1052  ;;  %1340 = vperm.xlu1 %2187, %v2684_v49  }
 0x1ae   : > { %v3060_v59 = vpop.permute.xlu0 %1080 }
 0x1af   : > { %1496 = vperm.xlu0 %2189, %v2676_v47   ;;  %v3063_v55 = vpop.permute.xlu1 %1060  ;;  %1348 = vperm.xlu1 %2187, %v2692_v51   ;;  %v664_v47 = vsub.f32 %v2759_v35, %v2986_v30  ;;  %v667_v35 = vsub.f32 %v2765_v7, %v2986_v30  ;;  %v681_v7 = vand.u32 2147483647, %v665_v41  ;;  %v773_v41 = vsub.f32 %v2842_v13, %v2977_v36 }
 0x1b1   : > { %v683_v34 = vand.u32 2147483647, %v667_v35  ;;  %v3135_v35 = vpop.f32.mrf.mxu0 }
 0x1b2   : > { %v3066_v50 = vpop.permute.xlu0 %1088 }
 0x1b3   : > { %1504 = vperm.xlu0 %2189, %v2684_v49   ;;  %v3069_v23 = vpop.permute.xlu1 %1068  ;;  %1356 = vperm.xlu1 %2187, %v2700_v53   ;;  %v764_v49 = vsub.f32 %v2814_v62, %v2977_v36  ;;  %v769_v62 = vsub.f32 %v2828_v24, %v2977_v36  ;;  %v771_v24 = vsub.f32 %v2836_v11, %v2977_v36 }
 0x1b5   : > { %v780_v29 = vand.u32 2147483647, %v764_v49  ;;  %v763_v49 = vsub.f32 %v2804_v60, %v2977_v36  ;;  %v787_v4 = vand.u32 2147483647, %v771_v24  ;;  %v766_v60 = vsub.f32 %v2818_v63, %v2977_v36 }
 0x1b6   : > { %v3072_v54 = vpop.permute.xlu0 %1096 }
 0x1b7   : > { %1512 = vperm.xlu0 %2189, %v2692_v51   ;;  %v3075_v3 = vpop.permute.xlu1 %1076  ;;  %2190 = vset.pattern.permute.xlu1 %v2393_v14  ;;  %v666_v51 = vsub.f32 %v2763_v6, %v2986_v30  ;;  %v767_v14 = vsub.f32 %v2822_v0, %v2977_v36  ;;  %v670_v6 = vsub.f32 %v2772_v37, %v2986_v30  ;;  %v680_v0 = vand.u32 2147483647, %v664_v47 }
 0x1b8   : > { %1464 = vperm.xlu1 %2190, %v2655_v43   ;;  %v673_v37 = vsub.f32 %v2784_v9, %v2986_v30  ;;  %v785_v47 = vand.u32 2147483647, %v769_v62  ;;  %v775_v9 = vsub.f32 %v2849_v15, %v2977_v36  ;;  %v879_v15 = vsub.f32 %v2863_v17, %v2989_v8  ;;  %v4359_v17 = vld [vmem:[#allocation5_spill] sm:$0xff] }
 0x1b9   : > { %v3106_v28 = vand.u32 2147483647, %v666_v51  ;;  %v783_v27 = vand.u32 2147483647, %v767_v14  ;;  %v686_v12 = vand.u32 2147483647, %v670_v6  ;;  %v675_v51 = vsub.f32 %v2791_v40, %v2986_v30 }
 0x1ba   : > { %v3094_v52 = vpop.permute.xlu0 %1104  ;;  %v765_v14 = vsub.f32 %v2812_v61, %v2977_v36  ;;  %v689_v13 = vand.u32 2147483647, %v673_v37  ;;  %v3145_v6 = vadd.f32 %v785_v47, %v685_v45  ;;  %v768_v40 = vsub.f32 %v2826_v5, %v2977_v36  ;;  %v4361_v45 = vld [vmem:[#allocation11_spill] sm:$0xff]  ;;  %v3158_v5 = vpop.f32.mrf.mxu0 }
 0x1bb   : > { %4352 = vst [vmem:[#allocation53_spill] sm:$0xff] %v3094_v52  ;;  %1520 = vperm.xlu0 %2189, %v2700_v53   ;;  %v3097_v43 = vpop.permute.xlu1 %1084  ;;  %v671_v53 = vsub.f32 %v2777_v38, %v2986_v30  ;;  %v796_v38 = vadd.f32 %v780_v29, %v680_v0  ;;  %v3129_v19 = vadd.f32 %v783_v27, %v683_v34  ;;  %v789_v0 = vand.u32 2147483647, %v773_v41  ;;  %v4362_v41 = vld [vmem:[#allocation13_spill] sm:$0xff]  ;;  %v4391_v34 = vld [vmem:[#allocation32_spill] sm:$0xff] }
 0x1bc   : > { %4353 = vst [vmem:[#allocation54_spill] sm:$0xff] %v3097_v43  ;;  %1468 = vperm.xlu1 %2190, %v2663_v44   ;;  %v770_v61 = vsub.f32 %v2832_v25, %v2977_v36  ;;  %v880_v62 = vsub.f32 %v2867_v20, %v2989_v8  ;;  %v779_v63 = vand.u32 2147483647, %v763_v49  ;;  %v791_v29 = vand.u32 2147483647, %v775_v9  ;;  %v4402_v43 = vld [vmem:[#allocation25_spill] sm:$0xff] }
 0x1bd   : > { %v687_v11 = vand.u32 2147483647, %v671_v53  ;;  %v4358_v53 = vld [vmem:[#allocation10_spill] sm:$0xff]  ;;  %v691_v27 = vand.u32 2147483647, %v675_v51 }
 0x1be   : > { %2223 = vrcp.f32 %v4358_v53  ;;  %v781_v24 = vand.u32 2147483647, %v765_v14  ;;  %v782_v47 = vand.u32 2147483647, %v766_v60  ;;  %v895_v20 = vand.u32 2147483647, %v879_v15 }
 0x1bf   : > { %v3118_v2 = vpop.permute.xlu1 %1092  ;;  %v3120_v44 = vpop.permute.xlu0 %1132  ;;  %2225 = vrcp.f32 %v4361_v45  ;;  %v3160_v25 = vadd.f32 %v787_v4, %v687_v11  ;;  %v784_v9 = vand.u32 2147483647, %v768_v40  ;;  %v786_v53 = vand.u32 2147483647, %v770_v61  ;;  %v4364_v51 = vld [vmem:[#allocation14_spill] sm:$0xff]  ;;  %v4367_v11 = vld [vmem:[#allocation15_spill] sm:$0xff] }
 0x1c0   : > { %4354 = vst [vmem:[#allocation55_spill] sm:$0xff] %v3118_v2  ;;  %4355 = vst [vmem:[#allocation56_spill] sm:$0xff] %v3120_v44  ;;  %1476 = vperm.xlu1 %2190, %v2681_v48   ;;  %2227 = vrcp.f32 %v4362_v41  ;;  %v3168_v14 = vadd.f32 %v789_v0, %v689_v13  ;;  %v795_v45 = vadd.f32 %v779_v63, %v679_v33  ;;  %v4368_v4 = vld [vmem:[#allocation6_spill] sm:$0xff]  ;;  %v4370_v61 = vld [vmem:[#allocation12_spill] sm:$0xff] }
 0x1c1   : > { %2229 = vrcp.f32 %v4364_v51  ;;  %v3170_v37 = vadd.f32 %v791_v29, %v691_v27  ;;  %v3174_v60 = vadd.f32 %v781_v24, %v681_v7  ;;  %v4371_v41 = vld [vmem:[#allocation16_spill] sm:$0xff]  ;;  %v3181_v51 = vpop.f32.mrf.mxu0  ;;  %v798_v33 = vadd.f32 %v782_v47, %v3106_v28  ;;  %v4372_v0 = vld [vmem:[#allocation17_spill] sm:$0xff]  ;;  %v4373_v63 = vld [vmem:[#allocation26_spill] sm:$0xff] }
 0x1c2   : > { %2231 = vrcp.f32 %v4367_v11  ;;  %v911_v13 = vadd.f32 %v895_v20, %v795_v45  ;;  %v882_v29 = vsub.f32 %v4373_v63, %v2989_v8  ;;  %v800_v27 = vadd.f32 %v784_v9, %v3112_v58  ;;  %v4378_v28 = vld [vmem:[#allocation28_spill] sm:$0xff]  ;;  %v4379_v20 = vld [vmem:[#allocation30_spill] sm:$0xff]  ;;  %v4381_v40 = vld [vmem:[#allocation7_spill] sm:$0xff] }
 0x1c3   : > { %v3141_v48 = vpop.permute.xlu1 %1100  ;;  %v3143_v39 = vpop.permute.xlu0 %1144  ;;  %4366 = vst [vmem:[#allocation11_spill] sm:$0xff] %v3170_v37  ;;  %2233 = vrcp.f32 %v4371_v41  ;;  %v802_v24 = vadd.f32 %v786_v53, %v686_v12  ;;  %v4377_v41 = vld [vmem:[#allocation20_spill] sm:$0xff]  ;;  %v884_v47 = vsub.f32 %v4378_v28, %v2989_v8  ;;  %v886_v45 = vsub.f32 %v4379_v20, %v2989_v8  ;;  %v4382_v12 = vld [vmem:[#allocation22_spill] sm:$0xff]  ;;  %v4385_v28 = vld [vmem:[#allocation31_spill] sm:$0xff] }
 0x1c4   : > { %4356 = vst [vmem:[#allocation57_spill] sm:$0xff] %v3141_v48  ;;  %4357 = vst [vmem:[#allocation58_spill] sm:$0xff] %v3143_v39  ;;  %1484 = vperm.xlu1 %2190, %v4359_v17   ;;  %v896_v17 = vand.u32 2147483647, %v880_v62  ;;  %v881_v62 = vsub.f32 %v4370_v61, %v2989_v8  ;;  %2235 = vrcp.f32 %v4372_v0  ;;  %v4380_v0 = vld [vmem:[#allocation37_spill] sm:$0xff]  ;;  %v3206_v53 = vpop.f32.mrf.mxu0  ;;  %v885_v20 = vsub.f32 %v4385_v28, %v2989_v8  ;;  %v3212_v37 = vpop.f32.mrf.mxu1  ;;  %v4393_v28 = vld [vmem:[#allocation36_spill] sm:$0xff] }
 0x1c5   : > { %v995_v63 = vsub.f32 %v4380_v0, %v3008_v21  ;;  %4386 = vst [vmem:[#allocation15_spill] sm:$0xff] %v3212_v37  ;;  %v4388_v0 = vld [vmem:[#allocation48_spill] sm:$0xff]  ;;  %v996_v15 = vsub.f32 %v4393_v28, %v3008_v21  ;;  %v902_v42 = vand.u32 2147483647, %v886_v45 }
 0x1c6   : > { %v3190_v11 = vadd.f32 %v896_v17, %v796_v38  ;;  %v897_v58 = vand.u32 2147483647, %v881_v62  ;;  %v4383_v38 = vld [vmem:[#allocation29_spill] sm:$0xff]  ;;  %v901_v48 = vand.u32 2147483647, %v885_v20 }
 0x1c7   : > { %v3163_v49 = vpop.permute.xlu0 %1152  ;;  %v883_v9 = vsub.f32 %v4383_v38, %v2989_v8  ;;  %v4384_v17 = vld [vmem:[#allocation41_spill] sm:$0xff]  ;;  %v4390_v38 = vld [vmem:[#allocation23_spill] sm:$0xff] }
 0x1c8   : > { %4363 = vst [vmem:[#allocation10_spill] sm:$0xff] %v3163_v49  ;;  %v3166_v57 = vpop.permute.xlu1 %1128  ;;  %1492 = vperm.xlu1 %2190, %v4368_v4   ;;  %v4375_v4 = vld [vmem:[#allocation18_spill] sm:$0xff] }
 0x1c9   : > { %4365 = vst [vmem:[#allocation5_spill] sm:$0xff] %v3166_v57  ;;  %2237 = vrcp.f32 %v4375_v4  ;;  %v998_v4 = vsub.f32 %v4384_v17, %v3008_v21  ;;  %v887_v17 = vsub.f32 %v4391_v34, %v2989_v8  ;;  %v4397_v34 = vld [vmem:[#allocation39_spill] sm:$0xff] }
 0x1ca   : > { %2239 = vrcp.f32 %v4377_v41  ;;  %v898_v41 = vand.u32 2147483647, %v882_v29  ;;  %v4392_v29 = vld [vmem:[#allocation33_spill] sm:$0xff]  ;;  %v997_v57 = vsub.f32 %v4397_v34, %v3008_v21 }
 0x1cb   : > { %v3187_v7 = vpop.permute.xlu0 %1160  ;;  %2241 = vrcp.f32 %v4382_v12  ;;  %v1002_v12 = vsub.f32 %v4388_v0, %v3008_v21  ;;  %v889_v36 = vsub.f32 %v4392_v29, %v2989_v8  ;;  %v1011_v0 = vand.u32 2147483647, %v995_v63  ;;  %v491_v29 = vpop.f32.mrf.mxu0 }
 0x1cc   : > { %4374 = vst [vmem:[#allocation13_spill] sm:$0xff] %v3187_v7  ;;  %v3193_v61 = vpop.permute.xlu1 %1136  ;;  %1500 = vperm.xlu1 %2190, %v4381_v40   ;;  %v4387_v40 = vld [vmem:[#allocation44_spill] sm:$0xff]  ;;  %2243 = vrcp.f32 %v4390_v38  ;;  %v4396_v38 = vld [vmem:[#allocation21_spill] sm:$0xff]  ;;  %v899_v7 = vand.u32 2147483647, %v883_v9  ;;  %v914_v28 = vadd.f32 %v898_v41, %v798_v33  ;;  %v4400_v9 = vld [vmem:[#allocation38_spill] sm:$0xff]  ;;  %v918_v41 = vadd.f32 %v902_v42, %v802_v24 }
 0x1cd   : > { %4376 = vst [vmem:[#allocation14_spill] sm:$0xff] %v3193_v61  ;;  %v1000_v62 = vsub.f32 %v4387_v40, %v3008_v21  ;;  %2245 = vrcp.f32 %v4395_v18  ;;  %v900_v40 = vand.u32 2147483647, %v884_v47  ;;  %v2319_v61 = vld [vmem:[%s2648_s8 + $0x60] sm:$0xff]  ;;  %v1014_v49 = vand.u32 2147483647, %v998_v4  ;;  %v3234_v18 = vpop.f32.mrf.mxu1 }
 0x1ce   : > { %2247 = vrcp.f32 %v4396_v38  ;;  %4398 = vst [vmem:[#allocation16_spill] sm:$0xff] %v3234_v18  ;;  %v1018_v47 = vand.u32 2147483647, %v1002_v12  ;;  %v903_v63 = vand.u32 2147483647, %v887_v17  ;;  %v999_v2 = vsub.f32 %v4400_v9, %v3008_v21 }
 0x1cf   : > { %v3218_v30 = vpop.permute.xlu0 %1168  ;;  %v905_v44 = vand.u32 2147483647, %v889_v36  ;;  %v1012_v38 = vand.u32 2147483647, %v996_v15  ;;  %2249 = vrcp.f32 %v4402_v43  ;;  %v916_v33 = vadd.f32 %v900_v40, %v800_v27  ;;  %v2095_v15 = vpop.f32.mrf.mxu0 }
 0x1d0   : > { %4389 = vst [vmem:[#allocation6_spill] sm:$0xff] %v3218_v30  ;;  %v3227_v37 = vpop.permute.xlu1 %1140  ;;  %1508 = vperm.xlu1 %2190, %v2319_v61   ;;  %v2224_v30 = vpop.eup %2223  ;;  %v1027_v20 = vadd.f32 %v1011_v0, %v911_v13  ;;  %v913_v18 = vadd.f32 %v897_v58, %v3174_v60  ;;  %v1013_v36 = vand.u32 2147483647, %v997_v57  ;;  %v1030_v17 = vadd.f32 %v1014_v49, %v914_v28  ;;  %v4410_v0 = vld [vmem:[#allocation40_spill] sm:$0xff] }
 0x1d1   : > { %4394 = vst [vmem:[#allocation12_spill] sm:$0xff] %v3227_v37  ;;  %v2226_v39 = vpop.eup %2225  ;;  %v1016_v37 = vand.u32 2147483647, %v1000_v62  ;;  %v2320_v62 = vld [vmem:[%s2648_s8 + $0x70] sm:$0xff]  ;;  %v915_v9 = vadd.f32 %v899_v7, %v3129_v19  ;;  %v2099_v27 = vpop.f32.mrf.mxu1  ;;  %v1034_v42 = vadd.f32 %v1018_v47, %v918_v41  ;;  %v3255_v60 = vadd.f32 %v903_v63, %v3160_v25 }
 0x1d2   : > { %v2228_v61 = vpop.eup %2227  ;;  %v3258_v57 = vadd.f32 %v905_v44, %v3168_v14  ;;  %v1028_v49 = vadd.f32 %v1012_v38, %v3190_v11  ;;  %v1015_v58 = vand.u32 2147483647, %v999_v2  ;;  %v3266_v7 = vmul.f32 %v2226_v39, %v3110_v56  ;;  %v4433_v14 = vld [vmem:[#allocation55_spill] sm:$0xff] }
 0x1d3   : > { %v3236_v45 = vpop.permute.xlu0 %1176  ;;  %v2230_v4 = vpop.eup %2229  ;;  %v1032_v43 = vadd.f32 %v1016_v37, %v916_v33  ;;  %4406 = vst [vmem:[#allocation28_spill] sm:$0xff] %v3255_v60  ;;  %v1831_v40 = vmul.f32 5.0, %v1027_v20  ;;  %v1001_v25 = vsub.f32 %v4410_v0, %v3008_v21  ;;  %v538_v11 = vmul.f32 %v2224_v30, %v3135_v35  ;;  %v4434_v0 = vld [vmem:[#allocation56_spill] sm:$0xff]  ;;  %v4440_v37 = vld [vmem:[#allocation13_spill] sm:$0xff] }
 0x1d4   : > { %4399 = vst [vmem:[#allocation17_spill] sm:$0xff] %v3236_v45  ;;  %v3240_v34 = vpop.permute.xlu1 %1148  ;;  %1516 = vperm.xlu1 %2190, %v2320_v62   ;;  %v2232_v12 = vpop.eup %2231  ;;  %v4403_v45 = vld [vmem:[#allocation27_spill] sm:$0xff]  ;;  %4407 = vst [vmem:[#allocation30_spill] sm:$0xff] %v3258_v57  ;;  %v1029_v2 = vadd.f32 %v1013_v36, %v913_v18  ;;  %v1834_v47 = vmul.f32 5.0, %v1030_v17  ;;  %v3275_v33 = vmul.f32 %v2230_v4, %v3181_v51  ;;  %v1838_v39 = vmul.f32 5.0, %v1034_v42 }
 0x1d5   : > { %4401 = vst [vmem:[#allocation26_spill] sm:$0xff] %v3240_v34  ;;  %2251 = vrcp.f32 %v4403_v45  ;;  %v2234_v52 = vpop.eup %2233  ;;  %v3248_v34 = vadd.f32 %v901_v48, %v3145_v6  ;;  %4409 = vst [vmem:[#allocation37_spill] sm:$0xff] %v3266_v7  ;;  %v494_v45 = vpop.f32.mrf.mxu0  ;;  %v1836_v56 = vmul.f32 5.0, %v1032_v43  ;;  %v3277_v20 = vmul.f32 5.0, %v1028_v49 }
 0x1d6   : > { %v3252_v24 = vpop.eup %2235  ;;  %v541_v38 = vmul.f32 %v2234_v52, %v3158_v5  ;;  %4412 = vst [vmem:[#allocation7_spill] sm:$0xff] %v3275_v33  ;;  %v510_v41 = vpop.f32.mrf.mxu1  ;;  %v3279_v21 = vadd.f32 %v1015_v58, %v915_v9  ;;  %v3282_v62 = vmul.f32 %v2232_v12, %v3206_v53  ;;  %v3284_v30 = vmul.f32 %v2228_v61, %v491_v29  ;;  %v3305_v61 = vld [vmem:[%s2503_s5 + $0x4] ss:$0 sm:$0xff] }
 0x1d7   : > { %4404 = vst [vmem:[#allocation18_spill] sm:$0xff] %v3248_v34  ;;  %v3250_v13 = vpop.permute.xlu0 %1184  ;;  %4405 = vst [vmem:[#allocation20_spill] sm:$0xff] %v3252_v24  ;;  %v2238_v48 = vpop.eup %2237  ;;  %v3290_v5 = vadd.f32 %v1831_v40, %v538_v11  ;;  %v3292_v51 = vand.u32 2147483647, %v1001_v25  ;;  %v3296_v9 = vmul.f32 5.0, %v1029_v2  ;;  %v4436_v11 = vld [vmem:[#allocation58_spill] sm:$0xff]  ;;  %v4447_v57 = vmin.f32 %v3032_v31, %v3305_v61 }
 0x1d8   : > { %v3261_v19 = vpop.permute.xlu1 %1156  ;;  %v2240_v28 = vpop.eup %2239  ;;  %4413 = vst [vmem:[#allocation22_spill] sm:$0xff] %v3277_v20  ;;  %4414 = vst [vmem:[#allocation29_spill] sm:$0xff] %v3279_v21  ;;  %v543_v36 = vmul.f32 %v2238_v48, %v494_v45  ;;  %v3298_v43 = vadd.f32 %v1834_v47, %v541_v38  ;;  %v3319_v48 = vmul.f32 5.0, %v3034_v26  ;;  %v4431_v45 = vld [vmem:[#allocation53_spill] sm:$0xff]  ;;  %v4438_v26 = vld [vmem:[#allocation10_spill] sm:$0xff]  ;;  %v4453_v21 = vmin.f32 %v3057_v46, %v3305_v61 }
 0x1d9   : > { %v2242_v63 = vpop.eup %2241  ;;  %4415 = vst [vmem:[#allocation41_spill] sm:$0xff] %v3282_v62  ;;  %4416 = vst [vmem:[#allocation31_spill] sm:$0xff] %v3284_v30  ;;  %v545_v4 = vmul.f32 %v2240_v28, %v2095_v15  ;;  %v3314_v15 = vmul.f32 5.0, %v3024_v16  ;;  %v4432_v16 = vld [vmem:[#allocation54_spill] sm:$0xff]  ;;  %v3388_v38 = vld [vmem:[%s2503_s5 + $0x5] ss:$0 sm:$0xff]  ;;  %v4446_v30 = vmax.f32 %v3032_v31, %v3305_v61  ;;  %v4451_v31 = vmin.f32 %v3039_v32, %v3305_v61 }
 0x1da   : > { %v2244_v52 = vpop.eup %2243  ;;  %4417 = vst [vmem:[#allocation44_spill] sm:$0xff] %v3290_v5  ;;  %4418 = vst [vmem:[#allocation48_spill] sm:$0xff] %v3292_v51  ;;  %v3302_v29 = vmul.f32 %v2242_v63, %v510_v41  ;;  %v3309_v42 = vadd.f32 %v1836_v56, %v543_v36  ;;  %v3399_v40 = vld [vmem:[%s2503_s5 + $0x6] ss:$0 sm:$0xff]  ;;  %v4442_v36 = vld [vmem:[#allocation6_spill] sm:$0xff] }
 0x1db   : > { %v3294_v17 = vpop.eup %2245  ;;  %4420 = vst [vmem:[#allocation32_spill] sm:$0xff] %v3296_v9  ;;  %4421 = vst [vmem:[#allocation33_spill] sm:$0xff] %v3298_v43  ;;  %v3300_v53 = vmul.f32 %v2244_v52, %v2099_v27  ;;  %v3311_v49 = vadd.f32 %v1838_v39, %v545_v4  ;;  %v4435_v56 = vld [vmem:[#allocation57_spill] sm:$0xff]  ;;  %v4443_v63 = vld [vmem:[#allocation12_spill] sm:$0xff]  ;;  %v4469_v43 = vmin.f32 %v4434_v0, %v3388_v38 }
 0x1dc   : > { %v3286_v35 = vpop.permute.xlu0 %1212  ;;  %v3288_v18 = vpop.permute.xlu1 %1164  ;;  %4419 = vst [vmem:[#allocation23_spill] sm:$0xff] %v3294_v17  ;;  %4423 = vst [vmem:[#allocation19_spill] sm:$0xff] %v3302_v29  ;;  %v4439_v2 = vld [vmem:[#allocation5_spill] sm:$0xff]  ;;  %v4445_v17 = vld [vmem:[#allocation26_spill] sm:$0xff] }
 0x1dd   : > { %4422 = vst [vmem:[#allocation36_spill] sm:$0xff] %v3300_v53  ;;  %v3307_v12 = vpop.eup %2247  ;;  %4425 = vst [vmem:[#allocation39_spill] sm:$0xff] %v3309_v42  ;;  %v1279_v44 = vmin.f32 %v3286_v35, %v3399_v40  ;;  %v1639_v58 = vmax.f32 %v3286_v35, %v3399_v40  ;;  %v4444_v35 = vld [vmem:[#allocation17_spill] sm:$0xff]  ;;  %v4472_v42 = vmin.f32 %v3075_v3, %v3305_v61 }
 0x1de   : > { %4424 = vst [vmem:[#allocation21_spill] sm:$0xff] %v3307_v12  ;;  %4426 = vst [vmem:[#allocation38_spill] sm:$0xff] %v3311_v49  ;;  %v3339_v47 = vpop.eup %2249  ;;  %v4441_v12 = vld [vmem:[#allocation14_spill] sm:$0xff]  ;;  %v4468_v49 = vmax.f32 %v4434_v0, %v3388_v38 }
 0x1df   : > { %4427 = vst [vmem:[#allocation25_spill] sm:$0xff] %v3314_v15  ;;  %4428 = vst [vmem:[#allocation27_spill] sm:$0xff] %v3319_v48  ;;  %v3461_v9 = vsub.f32 %v1639_v58, %v4447_v57  ;;  %v4449_v58 = vmin.f32 %v3051_v1, %v3305_v61  ;;  %v3598_v15 = vld [vmem:[%s2503_s5 + $0x7] ss:$0 sm:$0xff] }
 0x1e0   : > { %v3327_v25 = vpop.permute.xlu0 %1224  ;;  %v3329_v28 = vpop.permute.xlu1 %1172  ;;  %4429 = vst [vmem:[#allocation40_spill] sm:$0xff] %v3339_v47  ;;  %v3456_v47 = vsub.f32 %v1279_v44, %v4446_v30  ;;  %v4450_v44 = vmax.f32 %v3039_v32, %v3305_v61 }
 0x1e1   : > { %v1282_v24 = vmin.f32 %v3327_v25, %v3399_v40  ;;  %v1642_v8 = vmax.f32 %v3327_v25, %v3399_v40 }
 0x1e2   : > { %v3349_v39 = vpop.eup %2251 }
 0x1e3   : > { %4430 = vst [vmem:[#allocation59_spill] sm:$0xff] %v3349_v39  ;;  %v3490_v25 = vsub.f32 %v1282_v24, %v4450_v44  ;;  %v3495_v57 = vsub.f32 %v1642_v8, %v4451_v31 }
 0x1e4   : > { %v3367_v52 = vpop.permute.xlu0 %1232  ;;  %v3369_v4 = vpop.permute.xlu1 %1180 }
 0x1e8   : > { %v3409_v27 = vpop.permute.xlu0 %1240  ;;  %v3411_v41 = vpop.permute.xlu1 %1188 }
 0x1e9   : > { %4437 = vst [vmem:[#allocation53_spill] sm:$0xff] %v3411_v41  ;;  %v1286_v32 = vmin.f32 %v3409_v27, %v3399_v40  ;;  %v1646_v8 = vmax.f32 %v3409_v27, %v3399_v40 }
 0x1ec   : > { %v1249_v60 = vpop.permute.xlu0 %1248 }
 0x1ed   : > { %v1217_v6 = vpop.permute.xlu1 %1216  ;;  %v1288_v44 = vmin.f32 %v1249_v60, %v3399_v40  ;;  %v1648_v31 = vmax.f32 %v1249_v60, %v3399_v40  ;;  %v4456_v60 = vmax.f32 %v3054_v10, %v3305_v61 }
 0x1ee   : > { %v1280_v39 = vmin.f32 %v1217_v6, %v3399_v40  ;;  %v1640_v62 = vmax.f32 %v1217_v6, %v3399_v40  ;;  %v4448_v6 = vmax.f32 %v3051_v1, %v3305_v61 }
 0x1ef   : > { %v3544_v33 = vsub.f32 %v1286_v32, %v4456_v60  ;;  %v4460_v60 = vmax.f32 %v3063_v55, %v3305_v61 }
 0x1f0   : > { %v3480_v30 = vsub.f32 %v1280_v39, %v4448_v6  ;;  %v3485_v7 = vsub.f32 %v1640_v62, %v4449_v58  ;;  %v1257_v51 = vpop.permute.xlu0 %1256  ;;  %v1284_v39 = vmin.f32 %v3367_v52, %v3399_v40  ;;  %v1644_v6 = vmax.f32 %v3367_v52, %v3399_v40 }
 0x1f1   : > { %v1221_v1 = vpop.permute.xlu1 %1220  ;;  %v4452_v58 = vmax.f32 %v3057_v46, %v3305_v61  ;;  %v4454_v52 = vmax.f32 %v3046_v22, %v3305_v61  ;;  %v4455_v62 = vmin.f32 %v3046_v22, %v3305_v61  ;;  %v1290_v46 = vmin.f32 %v1257_v51, %v3399_v40 }
 0x1f2   : > { %v1281_v34 = vmin.f32 %v1221_v1, %v3399_v40  ;;  %v1641_v24 = vmax.f32 %v1221_v1, %v3399_v40 }
 0x1f3   : > { %v3530_v20 = vsub.f32 %v1284_v39, %v4454_v52  ;;  %v4457_v39 = vmin.f32 %v3054_v10, %v3305_v61 }
 0x1f4   : > { %v3518_v1 = vsub.f32 %v1281_v34, %v4452_v58  ;;  %v3523_v48 = vsub.f32 %v1641_v24, %v4453_v21  ;;  %v1265_v27 = vpop.permute.xlu0 %1264  ;;  %v3535_v34 = vsub.f32 %v1644_v6, %v4455_v62  ;;  %v1650_v21 = vmax.f32 %v1257_v51, %v3399_v40 }
 0x1f5   : > { %v1229_v58 = vpop.permute.xlu1 %1228  ;;  %v3549_v22 = vsub.f32 %v1646_v8, %v4457_v39  ;;  %v4458_v6 = vmax.f32 %v3060_v59, %v3305_v61  ;;  %v4459_v51 = vmin.f32 %v3060_v59, %v3305_v61  ;;  %v1652_v32 = vmax.f32 %v1265_v27, %v3399_v40 }
 0x1f6   : > { %v1283_v24 = vmin.f32 %v1229_v58, %v3399_v40  ;;  %v1643_v53 = vmax.f32 %v1229_v58, %v3399_v40  ;;  %v1292_v58 = vmin.f32 %v1265_v27, %v3399_v40  ;;  %v4461_v8 = vmin.f32 %v3063_v55, %v3305_v61 }
 0x1f7   : > { %v3554_v62 = vsub.f32 %v1288_v44, %v4458_v6  ;;  %v3559_v52 = vsub.f32 %v1648_v31, %v4459_v51  ;;  %v4462_v55 = vmax.f32 %v3066_v50, %v3305_v61  ;;  %v4467_v27 = vmin.f32 %v3069_v23, %v3305_v61 }
 0x1f8   : > { %v3566_v10 = vsub.f32 %v1283_v24, %v4460_v60  ;;  %v3571_v44 = vsub.f32 %v1643_v53, %v4461_v8  ;;  %v1273_v39 = vpop.permute.xlu0 %1272  ;;  %v4463_v60 = vmin.f32 %v3066_v50, %v3305_v61  ;;  %v4464_v50 = vmax.f32 %v3072_v54, %v3305_v61 }
 0x1f9   : > { %v1237_v51 = vpop.permute.xlu1 %1236  ;;  %v3584_v53 = vsub.f32 %v1290_v46, %v4462_v55  ;;  %v4466_v55 = vmin.f32 %v3072_v54, %v3305_v61  ;;  %v1396_v24 = vmax.f32 %v3480_v30, 0.0  ;;  %v1688_v6 = vmax.f32 %v3485_v7, 0.0 }
 0x1fa   : > { %v3589_v8 = vsub.f32 %v1650_v21, %v4463_v60  ;;  %v1645_v31 = vmax.f32 %v1237_v51, %v3399_v40  ;;  %v3604_v21 = vsub.f32 %v1292_v58, %v4464_v50  ;;  %v1294_v46 = vmin.f32 %v1273_v39, %v3399_v40 }
 0x1fb   : > { %v3609_v60 = vsub.f32 %v1652_v32, %v4466_v55  ;;  %v1654_v29 = vmax.f32 %v1273_v39, %v3399_v40  ;;  %v1285_v7 = vmin.f32 %v1237_v51, %v3399_v40  ;;  %v4471_v51 = vmin.f32 %v4431_v45, %v3305_v61 }
 0x1fc   : > { %4465 = vst [vmem:[#allocation54_spill] sm:$0xff] %v3604_v21  ;;  %v3614_v59 = vsub.f32 %v1645_v31, %v4467_v27  ;;  %v4470_v31 = vmax.f32 %v4431_v45, %v3305_v61 }
 0x1fd   : > { %v1301_v58 = vpop.permute.xlu0 %1300  ;;  %v1245_v50 = vpop.permute.xlu1 %1244  ;;  %v3644_v5 = vsub.f32 %v1654_v29, %v4471_v51  ;;  %v4473_v29 = vmax.f32 %v3069_v23, %v3305_v61 }
 0x1fe   : > { %v1364_v32 = vmin.f32 %v1301_v58, %v3598_v15  ;;  %v1656_v55 = vmax.f32 %v1301_v58, %v3598_v15  ;;  %v1647_v27 = vmax.f32 %v1245_v50, %v3399_v40  ;;  %v3639_v30 = vsub.f32 %v1294_v46, %v4470_v31 }
 0x1ff   : > { %v1287_v39 = vmin.f32 %v1245_v50, %v3399_v40  ;;  %v1399_v31 = vmax.f32 %v3566_v10, 0.0  ;;  %v1385_v45 = vsub.f32 %v1285_v7, %v4473_v29  ;;  %v1691_v10 = vmax.f32 %v3571_v44, 0.0 }
 0x200   : > { %v1412_v54 = vsub.f32 %v1364_v32, %v4468_v49  ;;  %v1704_v58 = vsub.f32 %v1656_v55, %v4469_v43  ;;  %v3650_v49 = vsub.f32 %v1647_v27, %v4472_v42  ;;  %v4476_v7 = vmax.f32 %v3075_v3, %v3305_v61 }
 0x201   : > { %v1313_v32 = vpop.permute.xlu0 %1312  ;;  %v1253_v0 = vpop.permute.xlu1 %1252  ;;  %v1401_v44 = vmax.f32 %v1385_v45, 0.0 }
 0x202   : > { %v1428_v43 = vmax.f32 %v1412_v54, 0.0  ;;  %v1720_v55 = vmax.f32 %v1704_v58, 0.0  ;;  %v1367_v21 = vmin.f32 %v1313_v32, %v3598_v15  ;;  %v1659_v46 = vmax.f32 %v1313_v32, %v3598_v15 }
 0x203   : > { %v1289_v50 = vmin.f32 %v1253_v0, %v3399_v40  ;;  %v1649_v51 = vmax.f32 %v1253_v0, %v3399_v40  ;;  %v4474_v54 = vmax.f32 %v4436_v11, %v3388_v38  ;;  %v4475_v58 = vmin.f32 %v4436_v11, %v3388_v38 }
 0x204   : > { %v3660_v42 = vmul.f32 %v1720_v55, %v1688_v6  ;;  %v3668_v41 = vmul.f32 %v1428_v43, %v1396_v24  ;;  %v1387_v0 = vsub.f32 %v1287_v39, %v4476_v7  ;;  %v4477_v6 = vmin.f32 %v4432_v16, %v3305_v61 }
 0x205   : > { %v1415_v27 = vsub.f32 %v1367_v21, %v4474_v54  ;;  %v1707_v32 = vsub.f32 %v1659_v46, %v4475_v58  ;;  %v1321_v21 = vpop.permute.xlu0 %1320  ;;  %v1261_v29 = vpop.permute.xlu1 %1260  ;;  %v1693_v54 = vmax.f32 %v3614_v59, 0.0  ;;  %v1695_v59 = vmax.f32 %v3650_v49, 0.0 }
 0x206   : > { %v3678_v55 = vsub.f32 %v1649_v51, %v4477_v6  ;;  %v1369_v43 = vmin.f32 %v1321_v21, %v3598_v15  ;;  %v1661_v58 = vmax.f32 %v1321_v21, %v3598_v15  ;;  %v1291_v3 = vmin.f32 %v1261_v29, %v3399_v40 }
 0x207   : > { %v1431_v46 = vmax.f32 %v1415_v27, 0.0  ;;  %v1723_v24 = vmax.f32 %v1707_v32, 0.0  ;;  %v4479_v51 = vmax.f32 %v4432_v16, %v3305_v61  ;;  %v4480_v27 = vmax.f32 %v4438_v26, %v3388_v38 }
 0x208   : > { %v1651_v6 = vmax.f32 %v1261_v29, %v3399_v40  ;;  %v1403_v45 = vmax.f32 %v1387_v0, 0.0  ;;  %v4481_v21 = vmin.f32 %v4438_v26, %v3388_v38  ;;  %v1768_v16 = vadd.f32 1e-08, %v3660_v42 }
 0x209   : > { %v3685_v39 = vmul.f32 %v1723_v24, %v1691_v10  ;;  %v3690_v7 = vsub.f32 %v1289_v50, %v4479_v51  ;;  %v1417_v32 = vsub.f32 %v1369_v43, %v4480_v27  ;;  %v1329_v10 = vpop.permute.xlu0 %1328  ;;  %v3700_v24 = vmul.f32 %v1431_v46, %v1399_v31  ;;  %v1269_v0 = vpop.permute.xlu1 %1268 }
 0x20a   : > { %v1709_v11 = vsub.f32 %v1661_v58, %v4481_v21  ;;  %v4483_v51 = vmin.f32 %v4433_v14, %v3305_v61  ;;  %v1371_v29 = vmin.f32 %v1329_v10, %v3598_v15  ;;  %v4484_v49 = vmax.f32 %v4433_v14, %v3305_v61 }
 0x20b   : > { %4478 = vst [vmem:[#allocation55_spill] sm:$0xff] %v3685_v39  ;;  %4482 = vst [vmem:[#allocation56_spill] sm:$0xff] %v3700_v24  ;;  %v1433_v50 = vmax.f32 %v1417_v32, 0.0  ;;  %v1663_v31 = vmax.f32 %v1329_v10, %v3598_v15  ;;  %v1293_v46 = vmin.f32 %v1269_v0, %v3399_v40  ;;  %v1771_v58 = vadd.f32 1e-08, %v3685_v39 }
 0x20c   : > { %v3706_v23 = vsub.f32 %v1651_v6, %v4483_v51  ;;  %v1725_v43 = vmax.f32 %v1709_v11, 0.0  ;;  %v3712_v26 = vsub.f32 %v1291_v3, %v4484_v49  ;;  %v4485_v32 = vmax.f32 %v4440_v37, %v3388_v38 }
 0x20d   : > { %v1653_v21 = vmax.f32 %v1269_v0, %v3399_v40  ;;  %v1697_v11 = vmax.f32 %v3678_v55, 0.0  ;;  %v4486_v14 = vmin.f32 %v4440_v37, %v3388_v38  ;;  %v1337_v10 = vpop.permute.xlu0 %1336  ;;  %v3728_v49 = vmul.f32 %v1433_v50, %v1401_v44 }
 0x20e   : > { %v1419_v6 = vsub.f32 %v1371_v29, %v4485_v32  ;;  %v3723_v51 = vmul.f32 %v1725_v43, %v1693_v54  ;;  %v4487_v27 = vmin.f32 %v4435_v56, %v3305_v61  ;;  %v1373_v29 = vmin.f32 %v1337_v10, %v3598_v15  ;;  %v1297_v44 = vpop.permute.xlu1 %1296 }
 0x20f   : > { %v1711_v3 = vsub.f32 %v1663_v31, %v4486_v14  ;;  %v1665_v40 = vmax.f32 %v1337_v10, %v3598_v15  ;;  %2253 = vrcp.f32 %v1768_v16  ;;  %v4488_v37 = vmax.f32 %v4435_v56, %v3305_v61 }
 0x210   : > { %v1435_v39 = vmax.f32 %v1419_v6, 0.0  ;;  %v3733_v24 = vsub.f32 %v1653_v21, %v4487_v27  ;;  %2255 = vrcp.f32 %v1771_v58  ;;  %v1699_v50 = vmax.f32 %v3706_v23, 0.0 }
 0x211   : > { %v1727_v54 = vmax.f32 %v1711_v3, 0.0  ;;  %v3741_v0 = vsub.f32 %v1293_v46, %v4488_v37  ;;  %v4489_v43 = vmin.f32 %v4442_v36, %v3388_v38  ;;  %v1363_v27 = vmin.f32 %v1297_v44, %v3598_v15  ;;  %v1345_v21 = vpop.permute.xlu0 %1344 }
 0x212   : > { %v1773_v16 = vadd.f32 1e-08, %v3723_v51  ;;  %v1655_v6 = vmax.f32 %v1297_v44, %v3598_v15  ;;  %v3752_v61 = vmul.f32 %v1435_v39, %v1403_v45  ;;  %v4490_v56 = vmax.f32 %v4442_v36, %v3388_v38  ;;  %v1305_v36 = vpop.permute.xlu1 %1304 }
 0x213   : > { %v1713_v31 = vsub.f32 %v1665_v40, %v4489_v43  ;;  %v3749_v32 = vmul.f32 %v1727_v54, %v1695_v59  ;;  %v4491_v58 = vmax.f32 %v4439_v2, %v3388_v38  ;;  %v1375_v3 = vmin.f32 %v1345_v21, %v3598_v15 }
 0x214   : > { %v3757_v46 = vsub.f32 %v1373_v29, %v4490_v56  ;;  %v1701_v10 = vmax.f32 %v3733_v24, 0.0  ;;  %v4492_v39 = vmin.f32 %v4439_v2, %v3388_v38  ;;  %v1667_v40 = vmax.f32 %v1345_v21, %v3598_v15 }
 0x215   : > { %v1729_v23 = vmax.f32 %v1713_v31, 0.0  ;;  %v1411_v14 = vsub.f32 %v1363_v27, %v4491_v58  ;;  %v1775_v29 = vadd.f32 1e-08, %v3749_v32  ;;  %v4493_v37 = vmax.f32 %v4444_v35, %v3388_v38 }
 0x216   : > { %v1703_v45 = vsub.f32 %v1655_v6, %v4492_v39  ;;  %v1365_v43 = vmin.f32 %v1305_v36, %v3598_v15  ;;  %2257 = vrcp.f32 %v1773_v16  ;;  %v4494_v2 = vmin.f32 %v4444_v35, %v3388_v38  ;;  %v1353_v6 = vpop.permute.xlu0 %1352 }
 0x217   : > { %v3770_v54 = vmul.f32 %v1729_v23, %v1697_v11  ;;  %v3775_v44 = vsub.f32 %v1375_v3, %v4493_v37  ;;  %v1657_v27 = vmax.f32 %v1305_v36, %v3598_v15  ;;  %v1437_v21 = vmax.f32 %v3757_v46, 0.0 }
 0x218   : > { %v1719_v24 = vmax.f32 %v1703_v45, 0.0  ;;  %v1715_v31 = vsub.f32 %v1667_v40, %v4494_v2  ;;  %v1427_v56 = vmax.f32 %v1411_v14, 0.0  ;;  %v1377_v23 = vmin.f32 %v1353_v6, %v3598_v15  ;;  %v1309_v40 = vpop.permute.xlu1 %1308 }
 0x219   : > { %v1777_v11 = vadd.f32 1e-08, %v3770_v54  ;;  %v4495_v58 = vmax.f32 %v3461_v9, 0.0  ;;  %v4496_v35 = vmin.f32 %v4441_v12, %v3388_v38  ;;  %v1669_v45 = vmax.f32 %v1353_v6, %v3598_v15 }
 0x21a   : > { %v1731_v16 = vmax.f32 %v1715_v31, 0.0  ;;  %2259 = vrcp.f32 %v1775_v29  ;;  %v4497_v14 = vmax.f32 %v4441_v12, %v3388_v38  ;;  %v1366_v9 = vmin.f32 %v1309_v40, %v3598_v15 }
 0x21b   : > { %v3787_v3 = vmul.f32 %v1719_v24, %v4495_v58  ;;  %v1705_v39 = vsub.f32 %v1657_v27, %v4496_v35  ;;  %v4499_v27 = vmin.f32 %v3250_v13, %v3388_v38  ;;  %v3807_v58 = vld [vmem:[%s2503_s5 + $0x8] ss:$0 sm:$0xff]  ;;  %2261 = vrcp.f32 %v1777_v11 }
 0x21c   : > { %v3797_v37 = vsub.f32 %v1365_v43, %v4497_v14  ;;  %v3801_v2 = vmul.f32 %v1731_v16, %v1699_v50  ;;  %v4500_v29 = vmax.f32 %v4443_v63, %v3388_v38  ;;  %v1658_v43 = vmax.f32 %v1309_v40, %v3598_v15  ;;  %v1461_v50 = vpop.permute.xlu0 %1460  ;;  %v1317_v59 = vpop.permute.xlu1 %1316 }
 0x21d   : > { %v1767_v24 = vadd.f32 1e-08, %v3787_v3  ;;  %v1721_v31 = vmax.f32 %v1705_v39, 0.0  ;;  %v1717_v6 = vsub.f32 %v1669_v45, %v4499_v27  ;;  %v4501_v35 = vmax.f32 %v3456_v47, 0.0 }
 0x21e   : > { %4498 = vst [vmem:[#allocation57_spill] sm:$0xff] %v3801_v2  ;;  %v1414_v12 = vsub.f32 %v1366_v9, %v4500_v29  ;;  %v4502_v16 = vmax.f32 %v3523_v48, 0.0  ;;  %v4503_v45 = vmax.f32 %v3250_v13, %v3388_v38  ;;  %v3826_v9 = vpop.eup %2253  ;;  %v4504_v47 = vmin.f32 %v4443_v63, %v3388_v38 }
 0x21f   : > { %v3815_v14 = vmul.f32 %v1427_v56, %v4501_v35  ;;  %2263 = vrcp.f32 %v1767_v24  ;;  %v1733_v27 = vmax.f32 %v1717_v6, 0.0  ;;  %v1527_v24 = vadd.f32 %v3807_v58, %v1461_v50 }
 0x220   : > { %v3819_v39 = vmul.f32 %v1721_v31, %v4502_v16  ;;  %v3824_v11 = vsub.f32 %v1377_v23, %v4503_v45  ;;  %v1430_v40 = vmax.f32 %v1414_v12, 0.0  ;;  %v1706_v56 = vsub.f32 %v1658_v43, %v4504_v47  ;;  %v3833_v31 = vpop.eup %2255  ;;  %v1473_v45 = vpop.permute.xlu0 %1472 }
 0x221   : > { %v1368_v48 = vmin.f32 %v1317_v59, %v3598_v15  ;;  %v1429_v29 = vmax.f32 %v3797_v37, 0.0  ;;  %v3837_v23 = vmul.f32 %v1733_v27, %v1701_v10  ;;  %v1660_v6 = vmax.f32 %v1317_v59, %v3598_v15 }
 0x222   : > { %v1769_v13 = vadd.f32 1e-08, %v3819_v39  ;;  %v1722_v35 = vmax.f32 %v1706_v56, 0.0  ;;  %v1543_v12 = vsub.f32 %v1527_v24, %v3815_v14  ;;  %v4505_v63 = vmax.f32 %v4445_v17, %v3388_v38  ;;  %v1325_v56 = vpop.permute.xlu1 %1324 }
 0x223   : > { %v4506_v50 = vmax.f32 %v3490_v25, 0.0  ;;  %v3849_v37 = vadd.f32 1e-08, %v3801_v2  ;;  %v4507_v59 = vmin.f32 %v4445_v17, %v3388_v38  ;;  %v1530_v47 = vadd.f32 %v3807_v58, %v1473_v45  ;;  %v3865_v17 = vpop.eup %2257  ;;  %v4533_v2 = vld [vmem:[#allocation54_spill] sm:$0xff] }
 0x224   : > { %v1416_v43 = vsub.f32 %v1368_v48, %v4505_v63  ;;  %v4508_v24 = vmax.f32 %v3495_v57, 0.0  ;;  %v1559_v25 = vadd.f32 1e-08, %v1543_v12  ;;  %2265 = vrcp.f32 %v1769_v13 }
 0x225   : > { %v3846_v16 = vmul.f32 %v1430_v40, %v4506_v50  ;;  %v1708_v27 = vsub.f32 %v1660_v6, %v4507_v59  ;;  %v1751_v40 = vsub.f32 %v3787_v3, %v1543_v12  ;;  %v1370_v10 = vmin.f32 %v1325_v56, %v3598_v15  ;;  %v1481_v3 = vpop.permute.xlu0 %1480 }
 0x226   : > { %v3858_v48 = vmul.f32 %v1722_v35, %v4508_v24  ;;  %v1432_v63 = vmax.f32 %v1416_v43, 0.0  ;;  %2267 = vrcp.f32 %v1559_v25  ;;  %v1662_v57 = vmax.f32 %v1325_v56, %v3598_v15  ;;  %v1333_v24 = vpop.permute.xlu1 %1332 }
 0x227   : > { %v1724_v50 = vmax.f32 %v1708_v27, 0.0  ;;  %v3862_v36 = vsub.f32 %v1530_v47, %v3846_v16  ;;  %v4509_v35 = vmax.f32 %v3530_v20, 0.0  ;;  %v4510_v13 = vmax.f32 %v3535_v34, 0.0 }
 0x228   : > { %v1770_v6 = vadd.f32 1e-08, %v3858_v48  ;;  %v4511_v27 = vmax.f32 %v3261_v19, %v3388_v38  ;;  %v4512_v20 = vmin.f32 %v3261_v19, %v3388_v38  ;;  %v1532_v25 = vadd.f32 %v3807_v58, %v1481_v3 }
 0x229   : > { %v3871_v45 = vmul.f32 %v1432_v63, %v4509_v35  ;;  %v3875_v12 = vmul.f32 %v1724_v50, %v4510_v13  ;;  %v1562_v43 = vadd.f32 1e-08, %v3862_v36  ;;  %v1372_v34 = vmin.f32 %v1333_v24, %v3598_v15  ;;  %v3888_v63 = vpop.eup %2259 }
 0x22a   : > { %v1418_v47 = vsub.f32 %v1370_v10, %v4511_v27  ;;  %2269 = vrcp.f32 %v1770_v6  ;;  %v1710_v56 = vsub.f32 %v1662_v57, %v4512_v20  ;;  %v1664_v13 = vmax.f32 %v1333_v24, %v3598_v15  ;;  %v1489_v57 = vpop.permute.xlu0 %1488  ;;  %v3902_v20 = vpop.eup %2261 }
 0x22b   : > { %v1772_v50 = vadd.f32 1e-08, %v3875_v12  ;;  %2271 = vrcp.f32 %v1562_v43  ;;  %v3893_v10 = vsub.f32 %v1532_v25, %v3871_v45  ;;  %v4513_v19 = vmax.f32 %v3288_v18, %v3388_v38  ;;  %v1341_v59 = vpop.permute.xlu1 %1340 }
 0x22c   : > { %v1434_v35 = vmax.f32 %v1418_v47, 0.0  ;;  %v1726_v55 = vmax.f32 %v1710_v56, 0.0  ;;  %v4514_v3 = vmax.f32 %v3518_v1, 0.0  ;;  %v4515_v43 = vmin.f32 %v3288_v18, %v3388_v38 }
 0x22d   : > { %v1420_v6 = vsub.f32 %v1372_v34, %v4513_v19  ;;  %2273 = vrcp.f32 %v1772_v50  ;;  %v4516_v24 = vmax.f32 %v3544_v33, 0.0  ;;  %v1534_v25 = vadd.f32 %v3807_v58, %v1489_v57  ;;  %v2264_v34 = vpop.eup %2263 }
 0x22e   : > { %v3900_v27 = vmul.f32 %v1429_v29, %v4514_v3  ;;  %v1712_v47 = vsub.f32 %v1664_v13, %v4515_v43  ;;  %v4517_v19 = vmax.f32 %v3549_v22, 0.0  ;;  %v1564_v29 = vadd.f32 1e-08, %v3893_v10 }
 0x22f   : > { %v3909_v56 = vmul.f32 %v1434_v35, %v4516_v24  ;;  %v1756_v50 = vsub.f32 %v3875_v12, %v3893_v10  ;;  %v1436_v3 = vmax.f32 %v1420_v6, 0.0  ;;  %v1799_v18 = vmul.f32 %v2264_v34, %v1751_v40  ;;  %v1497_v24 = vpop.permute.xlu0 %1496 }
 0x230   : > { %v3914_v1 = vmul.f32 %v1726_v55, %v4517_v19  ;;  %v1728_v13 = vmax.f32 %v1712_v47, 0.0  ;;  %v1374_v35 = vmin.f32 %v1341_v59, %v3598_v15  ;;  %2275 = vrcp.f32 %v1564_v29  ;;  %v1349_v29 = vpop.permute.xlu1 %1348 }
 0x231   : > { %v3920_v33 = vsub.f32 %v1534_v25, %v3909_v56  ;;  %v1666_v22 = vmax.f32 %v1341_v59, %v3598_v15  ;;  %v4518_v55 = vmax.f32 %v3554_v62, 0.0  ;;  %v4519_v19 = vmax.f32 %v3559_v52, 0.0  ;;  %v3946_v47 = vpop.eup %2265 }
 0x232   : > { %v1774_v57 = vadd.f32 1e-08, %v3914_v1  ;;  %v4520_v25 = vmax.f32 %v3329_v28, %v3388_v38  ;;  %v4521_v62 = vmin.f32 %v3329_v28, %v3388_v38  ;;  %v1536_v52 = vadd.f32 %v3807_v58, %v1497_v24 }
 0x233   : > { %v3927_v43 = vmul.f32 %v1436_v3, %v4518_v55  ;;  %v3931_v6 = vmul.f32 %v1728_v13, %v4519_v19  ;;  %v1566_v40 = vadd.f32 1e-08, %v3920_v33  ;;  %v1376_v3 = vmin.f32 %v1349_v29, %v3598_v15 }
 0x234   : > { %v1422_v34 = vsub.f32 %v1374_v35, %v4520_v25  ;;  %2277 = vrcp.f32 %v1774_v57  ;;  %v1714_v59 = vsub.f32 %v1666_v22, %v4521_v62  ;;  %v1668_v19 = vmax.f32 %v1349_v29, %v3598_v15  ;;  %v1505_v22 = vpop.permute.xlu0 %1504 }
 0x235   : > { %v1776_v13 = vadd.f32 1e-08, %v3931_v6  ;;  %2279 = vrcp.f32 %v1566_v40  ;;  %v3949_v25 = vsub.f32 %v1536_v52, %v3927_v43  ;;  %v4522_v28 = vmax.f32 %v3369_v4, %v3388_v38  ;;  %v2268_v40 = vpop.eup %2267 }
 0x236   : > { %v1438_v55 = vmax.f32 %v1422_v34, 0.0  ;;  %v1730_v35 = vmax.f32 %v1714_v59, 0.0  ;;  %v4523_v24 = vmax.f32 %v3690_v7, 0.0  ;;  %v4524_v34 = vmin.f32 %v3369_v4, %v3388_v38 }
 0x237   : > { %v1424_v57 = vsub.f32 %v1376_v3, %v4522_v28  ;;  %2281 = vrcp.f32 %v1776_v13  ;;  %v4525_v59 = vmax.f32 %v3584_v53, 0.0  ;;  %v1538_v3 = vadd.f32 %v3807_v58, %v1505_v22  ;;  %v1357_v28 = vpop.permute.xlu1 %1356  ;;  %v2270_v4 = vpop.eup %2269 }
 0x238   : > { %v3958_v62 = vmul.f32 %v1437_v21, %v4523_v24  ;;  %v1716_v29 = vsub.f32 %v1668_v19, %v4524_v34  ;;  %v1591_v7 = vmul.f32 %v2268_v40, %v3815_v14  ;;  %v4526_v46 = vmax.f32 %v3589_v8, 0.0  ;;  %v2272_v22 = vpop.eup %2271 }
 0x239   : > { %v3966_v52 = vmul.f32 %v1438_v55, %v4525_v59  ;;  %v1568_v24 = vadd.f32 1e-08, %v3949_v25  ;;  %v1440_v19 = vmax.f32 %v1424_v57, 0.0  ;;  %v1378_v55 = vmin.f32 %v1357_v28, %v3598_v15  ;;  %v1513_v59 = vpop.permute.xlu0 %1512 }
 0x23a   : > { %v3972_v21 = vmul.f32 %v1730_v35, %v4526_v46  ;;  %v1732_v34 = vmax.f32 %v1716_v29, 0.0  ;;  %v1815_v14 = vsub.f32 %v1591_v7, %v1799_v18  ;;  %v4527_v8 = vsub.f32 %v3858_v48, %v3862_v36  ;;  %v2274_v18 = vpop.eup %2273  ;;  %v4529_v36 = vld [vmem:[#allocation53_spill] sm:$0xff] }
 0x23b   : > { %v3978_v53 = vsub.f32 %v1538_v3, %v3966_v52  ;;  %2283 = vrcp.f32 %v1568_v24  ;;  %v1594_v57 = vmul.f32 %v2272_v22, %v3846_v16  ;;  %v4528_v29 = vmax.f32 %v3609_v60, 0.0  ;;  %v4531_v22 = vld [vmem:[#allocation44_spill] sm:$0xff] }
 0x23c   : > { %v1802_v35 = vmul.f32 %v2270_v4, %v4527_v8  ;;  %v1778_v40 = vadd.f32 1e-08, %v3972_v21  ;;  %v1863_v7 = vmul.f32 -2.0, %v1815_v14  ;;  %v4530_v48 = vmax.f32 %v4529_v36, %v3388_v38  ;;  %v1465_v8 = vpop.permute.xlu1 %1464 }
 0x23d   : > { %v3990_v3 = vmul.f32 %v1732_v34, %v4528_v29  ;;  %v1570_v46 = vadd.f32 1e-08, %v3978_v53  ;;  %v1670_v24 = vmax.f32 %v1357_v28, %v3598_v15  ;;  %v1804_v60 = vmul.f32 %v2274_v18, %v1756_v50  ;;  %v1521_v15 = vpop.permute.xlu0 %1520  ;;  %v2276_v28 = vpop.eup %2275 }
 0x23e   : > { %2285 = vrcp.f32 %v1778_v40  ;;  %v1426_v4 = vsub.f32 %v1378_v55, %v4530_v48  ;;  %v1818_v16 = vsub.f32 %v1594_v57, %v1802_v35  ;;  %v1879_v29 = vadd.f32 %v1863_v7, %v4531_v22  ;;  %v4536_v7 = vld [vmem:[#allocation33_spill] sm:$0xff] }
 0x23f   : > { %v1780_v34 = vadd.f32 1e-08, %v3990_v3  ;;  %2287 = vrcp.f32 %v1570_v46  ;;  %v4532_v14 = vmin.f32 %v4529_v36, %v3388_v38  ;;  %v4534_v55 = vmax.f32 %v4533_v2, 0.0 }
 0x240   : > { %v1442_v13 = vmax.f32 %v1426_v4, 0.0  ;;  %v1866_v35 = vmul.f32 -2.0, %v1818_v16  ;;  %v1540_v12 = vadd.f32 %v3807_v58, %v1513_v59  ;;  %v1528_v10 = vadd.f32 %v3807_v58, %v1465_v8  ;;  %1895 = vst [vmem:[%s4013_s11] sm:$0xff] %v1879_v29  ;;  %v1469_v46 = vpop.permute.xlu1 %1468 }
 0x241   : > { %v1718_v40 = vsub.f32 %v1670_v24, %v4532_v14  ;;  %v4009_v48 = vmul.f32 %v1440_v19, %v4534_v55  ;;  %2289 = vrcp.f32 %v1780_v34  ;;  %v1596_v38 = vmul.f32 %v2276_v28, %v3871_v45  ;;  %v2278_v18 = vpop.eup %2277 }
 0x242   : > { %v4535_v2 = vmax.f32 %v3639_v30, 0.0  ;;  %v1542_v57 = vadd.f32 %v3807_v58, %v1521_v15  ;;  %v1882_v59 = vadd.f32 %v1866_v35, %v4536_v7  ;;  %v1544_v4 = vsub.f32 %v1528_v10, %v3668_v41  ;;  %v2280_v8 = vpop.eup %2279  ;;  %v4043_v15 = vpop.f32.mrf.mxu1 }
 0x243   : > { %v1734_v50 = vmax.f32 %v1718_v40, 0.0  ;;  %v4024_v36 = vsub.f32 %v1540_v12, %v4009_v48  ;;  %v1529_v24 = vadd.f32 %v3807_v58, %v1469_v46  ;;  %v1820_v45 = vsub.f32 %v1596_v38, %v1804_v60  ;;  %v4540_v38 = vld [vmem:[#allocation39_spill] sm:$0xff] }
 0x244   : > { %v4019_v19 = vmul.f32 %v1442_v13, %v4535_v2  ;;  %v4537_v30 = vsub.f32 %v3914_v1, %v3920_v33  ;;  %v4538_v16 = vmax.f32 %v3644_v5, 0.0  ;;  %1898 = vst [vmem:[%s4013_s11 + $0x18] sm:$0xff] %v1882_v59  ;;  %v1598_v29 = vmul.f32 %v2280_v8, %v3909_v56  ;;  %v2282_v55 = vpop.eup %2281  ;;  %v1477_v35 = vpop.permute.xlu1 %1476 }
 0x245   : > { %v1572_v14 = vadd.f32 1e-08, %v4024_v36  ;;  %v1764_v40 = vsub.f32 %v3990_v3, %v4024_v36  ;;  %v1560_v60 = vadd.f32 1e-08, %v1544_v4  ;;  %v1868_v1 = vmul.f32 -2.0, %v1820_v45  ;;  %v4065_v59 = vpop.f32.mrf.mxu1  ;;  %v4543_v45 = vld [vmem:[#allocation38_spill] sm:$0xff] }
 0x246   : > { %v1806_v13 = vmul.f32 %v2278_v18, %v4537_v30  ;;  %v4033_v34 = vmul.f32 %v1734_v50, %v4538_v16  ;;  %v4036_v22 = vsub.f32 %v1542_v57, %v4019_v19  ;;  %v1752_v33 = vsub.f32 %v3660_v42, %v1544_v4 }
 0x247   : > { %v4539_v56 = vsub.f32 %v3931_v6, %v3949_v25  ;;  %2291 = vrcp.f32 %v1572_v14  ;;  %v1884_v50 = vadd.f32 %v1868_v1, %v4540_v38  ;;  %v1545_v42 = vsub.f32 %v1529_v24, %v3900_v27  ;;  %v2103_v38 = vpop.f32.mrf.mxu1 }
 0x248   : > { %v1782_v5 = vadd.f32 1e-08, %v4033_v34  ;;  %v1574_v28 = vadd.f32 1e-08, %v4036_v22  ;;  %v1822_v12 = vsub.f32 %v1598_v29, %v1806_v13  ;;  %v1766_v3 = vsub.f32 %v4033_v34, %v4036_v22  ;;  %v2284_v57 = vpop.eup %2283  ;;  %v1485_v24 = vpop.permute.xlu1 %1484  ;;  %v4544_v13 = vld [vmem:[#allocation56_spill] sm:$0xff] }
 0x249   : > { %v1808_v10 = vmul.f32 %v2282_v55, %v4539_v56  ;;  %v4055_v2 = vmul.f32 %v3826_v9, %v1752_v33  ;;  %v1531_v18 = vadd.f32 %v3807_v58, %v1477_v35  ;;  %v4541_v6 = vmax.f32 %v3712_v26, 0.0  ;;  %1900 = vst [vmem:[%s4013_s11 + $0x28] sm:$0xff] %v1884_v50  ;;  %v4550_v56 = vld [vmem:[#allocation25_spill] sm:$0xff] }
 0x24a   : > { %2293 = vrcp.f32 %v1782_v5  ;;  %v1870_v46 = vmul.f32 -2.0, %v1822_v12  ;;  %v4542_v25 = vmax.f32 %v3775_v44, 0.0  ;;  %v1600_v9 = vmul.f32 %v2284_v57, %v3927_v43  ;;  %v4549_v12 = vld [vmem:[#allocation19_spill] sm:$0xff] }
 0x24b   : > { %2295 = vrcp.f32 %v1560_v60  ;;  %v1561_v36 = vadd.f32 1e-08, %v1545_v42  ;;  %v1753_v4 = vsub.f32 %v3819_v39, %v1545_v42  ;;  %v2286_v8 = vpop.eup %2285  ;;  %v1547_v26 = vsub.f32 %v1531_v18, %v4544_v13 }
 0x24c   : > { %v4063_v7 = vmul.f32 %v4542_v25, %v4541_v6  ;;  %2297 = vrcp.f32 %v1574_v28  ;;  %v1886_v30 = vadd.f32 %v1870_v46, %v4543_v45  ;;  %v1533_v44 = vadd.f32 %v3807_v58, %v1485_v24  ;;  %v2288_v60 = vpop.eup %2287  ;;  %v4548_v28 = vld [vmem:[#allocation55_spill] sm:$0xff] }
 0x24d   : > { %v4545_v16 = vmax.f32 %v3741_v0, 0.0  ;;  %v4546_v29 = vmax.f32 %v3824_v11, 0.0  ;;  %v1824_v43 = vsub.f32 %v1600_v9, %v1808_v10  ;;  %v4547_v55 = vsub.f32 %v3972_v21, %v3978_v53  ;;  %v1493_v53 = vpop.permute.xlu1 %1492  ;;  %v4551_v25 = vld [vmem:[#allocation7_spill] sm:$0xff]  ;;  %v4552_v9 = vld [vmem:[#allocation22_spill] sm:$0xff] }
 0x24e   : > { %2299 = vrcp.f32 %v1561_v36  ;;  %v4083_v1 = vmul.f32 %v3946_v47, %v1753_v4  ;;  %1902 = vst [vmem:[%s4013_s11 + $0x38] sm:$0xff] %v1886_v30  ;;  %v1602_v5 = vmul.f32 %v2288_v60, %v3966_v52  ;;  %v1563_v33 = vadd.f32 1e-08, %v1547_v26  ;;  %v2290_v35 = vpop.eup %2289  ;;  %v4103_v36 = vld [vmem:[%s2503_s5 + $0x3] ss:$0 sm:$0xff]  ;;  %v4553_v4 = vld [vmem:[#allocation42_spill] sm:$0xff] }
 0x24f   : > { %v4077_v14 = vmul.f32 %v4546_v29, %v4545_v16  ;;  %v1810_v39 = vmul.f32 %v2286_v8, %v4547_v55  ;;  %v1755_v0 = vsub.f32 %v4548_v28, %v1547_v26  ;;  %v1549_v11 = vsub.f32 %v1533_v44, %v3728_v49  ;;  %v4555_v8 = vld [vmem:[#allocation27_spill] sm:$0xff]  ;;  %v4556_v30 = vld [vmem:[#allocation29_spill] sm:$0xff]  ;;  %v526_v44 = vpop.f32.mrf.mxu1  ;;  %v4557_v60 = vld [vmem:[#allocation18_spill] sm:$0xff] }
 0x250   : > { %v1856_v10 = vadd.f32 %v4550_v56, %v4549_v12  ;;  %2301 = vrcp.f32 %v3849_v37  ;;  %v1781_v21 = vadd.f32 1e-08, %v3837_v23  ;;  %v1872_v47 = vmul.f32 -2.0, %v1824_v43  ;;  %v4558_v43 = vld [vmem:[#allocation48_spill] sm:$0xff]  ;;  %v4559_v28 = vld [vmem:[#allocation37_spill] sm:$0xff] }
 0x251   : > { %v1826_v50 = vsub.f32 %v1602_v5, %v1810_v39  ;;  %v1812_v52 = vmul.f32 %v2290_v35, %v1764_v40  ;;  %2303 = vrcp.f32 %v1563_v33  ;;  %v4094_v42 = vmul.f32 %v3833_v31, %v1755_v0  ;;  %v4554_v40 = vld [vmem:[#allocation36_spill] sm:$0xff]  ;;  %v1501_v29 = vpop.permute.xlu1 %1500  ;;  %v4561_v35 = vld [vmem:[#allocation51_spill] sm:$0xff] }
 0x252   : > { %v1888_v57 = vadd.f32 %v1872_v47, %v1856_v10  ;;  %v1565_v46 = vadd.f32 1e-08, %v1549_v11  ;;  %v1757_v18 = vsub.f32 %v3723_v51, %v1549_v11  ;;  %v1535_v6 = vadd.f32 %v3807_v58, %v1493_v53  ;;  %v4560_v0 = vld [vmem:[#allocation32_spill] sm:$0xff] }
 0x253   : > { %v4100_v37 = vadd.f32 %v4552_v9, %v4551_v25  ;;  %v1003_v24 = vsub.f32 %v4553_v4, %v4103_v36  ;;  %v1858_v45 = vadd.f32 %v4555_v8, %v4554_v40  ;;  %v1874_v31 = vmul.f32 -2.0, %v1826_v50  ;;  %v4562_v53 = vld [vmem:[#allocation40_spill] sm:$0xff] }
 0x254   : > { %v4110_v26 = vmul.f32 5.0, %v4556_v30  ;;  %1904 = vst [vmem:[%s4013_s11 + $0x48] sm:$0xff] %v1888_v57  ;;  %2305 = vrcp.f32 %v1565_v46  ;;  %v4114_v51 = vmul.f32 %v3865_v17, %v1757_v18  ;;  %v1551_v16 = vsub.f32 %v1535_v6, %v3752_v61  ;;  %v2292_v33 = vpop.eup %2291  ;;  %v4563_v18 = vld [vmem:[#allocation52_spill] sm:$0xff] }
 0x255   : > { %v1033_v55 = vadd.f32 %v4558_v43, %v4557_v60  ;;  %2307 = vrcp.f32 %v1781_v21  ;;  %v1890_v39 = vadd.f32 %v1874_v31, %v1858_v45  ;;  %v1537_v5 = vadd.f32 %v3807_v58, %v1501_v29  ;;  %v4564_v45 = vld [vmem:[#allocation59_spill] sm:$0xff] }
 0x256   : > { %v4122_v11 = vadd.f32 %v4560_v0, %v4559_v28  ;;  %v1844_v12 = vmul.f32 5.0, %v4561_v35  ;;  %v1567_v56 = vadd.f32 1e-08, %v1551_v16  ;;  %v1759_v17 = vsub.f32 %v3749_v32, %v1551_v16  ;;  %v1509_v32 = vpop.permute.xlu1 %1508  ;;  %v4566_v35 = vld [vmem:[#allocation57_spill] sm:$0xff] }
 0x257   : > { %v2294_v10 = vpop.eup %2293  ;;  %v1019_v47 = vand.u32 2147483647, %v1003_v24  ;;  %v551_v50 = vmul.f32 %v4562_v53, %v526_v44  ;;  %1906 = vst [vmem:[%s4013_s11 + $0x58] sm:$0xff] %v1890_v39  ;;  %v1604_v21 = vmul.f32 %v2292_v33, %v4009_v48  ;;  %v1553_v57 = vsub.f32 %v1537_v5, %v3958_v62 }
 0x258   : > { %v2296_v46 = vpop.eup %2295  ;;  %v1846_v6 = vmul.f32 5.0, %v4563_v18  ;;  %v1814_v25 = vmul.f32 %v2294_v10, %v1766_v3  ;;  %2309 = vrcp.f32 %v1567_v56  ;;  %v4135_v9 = vmul.f32 %v3888_v63, %v1759_v17  ;;  %v4567_v18 = vld [vmem:[#allocation28_spill] sm:$0xff] }
 0x259   : > { %v2298_v4 = vpop.eup %2297  ;;  %v1828_v24 = vsub.f32 %v1604_v21, %v1812_v52  ;;  %v1592_v40 = vmul.f32 %v2296_v46, %v3668_v41  ;;  %v1569_v8 = vadd.f32 1e-08, %v1553_v57  ;;  %v1761_v48 = vsub.f32 %v3770_v54, %v1553_v57  ;;  %v4565_v41 = vld [vmem:[#allocation47_spill] sm:$0xff] }
 0x25a   : > { %v553_v31 = vmul.f32 %v4564_v45, %v2103_v38  ;;  %v1860_v30 = vadd.f32 %v1844_v12, %v551_v50  ;;  %v1606_v44 = vmul.f32 %v2298_v4, %v4019_v19  ;;  %v1539_v34 = vadd.f32 %v3807_v58, %v1509_v32  ;;  %v1517_v19 = vpop.permute.xlu1 %1516  ;;  %v4571_v45 = vld [vmem:[#allocation43_spill] sm:$0xff] }
 0x25b   : > { %v2300_v22 = vpop.eup %2299  ;;  %v1876_v3 = vmul.f32 -2.0, %v1828_v24  ;;  %v1816_v63 = vsub.f32 %v1592_v40, %v4055_v2  ;;  %2311 = vrcp.f32 %v1569_v8  ;;  %v4144_v16 = vmul.f32 %v3902_v20, %v1761_v48  ;;  %v4569_v24 = vld [vmem:[#allocation31_spill] sm:$0xff]  ;;  %v4570_v48 = vld [vmem:[#allocation9_spill] sm:$0xff] }
 0x25c   : > { %v1005_v52 = vsub.f32 %v4565_v41, %v4103_v36  ;;  %v1830_v54 = vsub.f32 %v1606_v44, %v1814_v25  ;;  %v1593_v38 = vmul.f32 %v2300_v22, %v3900_v27  ;;  %v1555_v29 = vsub.f32 %v1539_v34, %v4063_v7  ;;  %v4575_v44 = vld [vmem:[#allocation46_spill] sm:$0xff] }
 0x25d   : > { %v2302_v60 = vpop.eup %2301  ;;  %v1862_v43 = vadd.f32 %v1846_v6, %v553_v31  ;;  %v1892_v39 = vadd.f32 %v1876_v3, %v1860_v30  ;;  %v1864_v5 = vmul.f32 -2.0, %v1816_v63  ;;  %v1541_v2 = vadd.f32 %v3807_v58, %v1517_v19  ;;  %v4573_v30 = vld [vmem:[#allocation24_spill] sm:$0xff]  ;;  %v4577_v3 = vld [vmem:[#allocation41_spill] sm:$0xff]  ;;  %v4578_v63 = vld [vmem:[#allocation30_spill] sm:$0xff] }
 0x25e   : > { %v2304_v33 = vpop.eup %2303  ;;  %v1878_v20 = vmul.f32 -2.0, %v1830_v54  ;;  %v1817_v28 = vsub.f32 %v1593_v38, %v4083_v1  ;;  %v1571_v0 = vadd.f32 1e-08, %v1555_v29  ;;  %v1763_v12 = vsub.f32 %v4566_v35, %v1555_v29  ;;  %v4585_v35 = vld [vmem:[#allocation11_spill] sm:$0xff] }
 0x25f   : > { %v1837_v56 = vmul.f32 5.0, %v1033_v55  ;;  %1908 = vst [vmem:[%s4013_s11 + $0x68] sm:$0xff] %v1892_v39  ;;  %v1880_v27 = vadd.f32 %v1864_v5, %v4100_v37  ;;  %v1595_v17 = vmul.f32 %v2304_v33, %v4544_v13  ;;  %v1557_v10 = vsub.f32 %v1541_v2, %v4077_v14  ;;  %v4568_v13 = vld [vmem:[#allocation49_spill] sm:$0xff]  ;;  %v4580_v39 = vld [vmem:[#allocation8_spill] sm:$0xff] }
 0x260   : > { %v1894_v53 = vadd.f32 %v1878_v20, %v1862_v43  ;;  %v1865_v50 = vmul.f32 -2.0, %v1817_v28  ;;  %2313 = vrcp.f32 %v1571_v0  ;;  %v4157_v58 = vmul.f32 %v2302_v60, %v1763_v12  ;;  %v4581_v5 = vld [vmem:[#allocation45_spill] sm:$0xff] }
 0x261   : > { %v2306_v21 = vpop.eup %2305  ;;  %v1021_v57 = vand.u32 2147483647, %v1005_v52  ;;  %1896 = vst [vmem:[%s4013_s11 + $0x8] sm:$0xff] %v1880_v27  ;;  %v1819_v1 = vsub.f32 %v1595_v17, %v4094_v42  ;;  %v1573_v55 = vadd.f32 1e-08, %v1557_v10  ;;  %v1765_v46 = vsub.f32 %v3837_v23, %v1557_v10  ;;  %v4579_v52 = vld [vmem:[#allocation50_spill] sm:$0xff] }
 0x262   : > { %v2308_v37 = vpop.eup %2307  ;;  %v1035_v6 = vadd.f32 %v1019_v47, %v4567_v18  ;;  %v1007_v25 = vsub.f32 %v4568_v13, %v4103_v36  ;;  %1910 = vst [vmem:[%s4013_s11 + $0x78] sm:$0xff] %v1894_v53  ;;  %v1881_v32 = vadd.f32 %v1865_v50, %v4122_v11  ;;  %v1597_v4 = vmul.f32 %v2306_v21, %v3728_v49  ;;  %v4574_v47 = vld [vmem:[#allocation34_spill] sm:$0xff]  ;;  %v4589_v18 = vld [vmem:[#allocation23_spill] sm:$0xff] }
 0x263   : > { %v1851_v40 = vadd.f32 %v4110_v26, %v4569_v24  ;;  %v1867_v8 = vmul.f32 -2.0, %v1819_v1  ;;  %2315 = vrcp.f32 %v1573_v55  ;;  %v1813_v42 = vmul.f32 %v2308_v37, %v1765_v46  ;;  %v4588_v37 = vld [vmem:[#allocation15_spill] sm:$0xff] }
 0x264   : > { %v4572_v23 = vsub.f32 %v4570_v48, %v4571_v45  ;;  %2317 = vrcp.f32 %v4573_v30  ;;  %v4576_v34 = vsub.f32 %v4574_v47, %v4575_v44  ;;  %1897 = vst [vmem:[%s4013_s11 + $0x10] sm:$0xff] %v1881_v32  ;;  %v1821_v49 = vsub.f32 %v1597_v4, %v4114_v51  ;;  %v4583_v51 = vld [vmem:[#allocation35_spill] sm:$0xff]  ;;  %v4590_v45 = vld [vmem:[#allocation21_spill] sm:$0xff] }
 0x265   : > { %v2310_v11 = vpop.eup %2309  ;;  %v1853_v26 = vadd.f32 %v1837_v56, %v4577_v3  ;;  %v1037_v41 = vadd.f32 %v1021_v57, %v4578_v63  ;;  %v1009_v54 = vsub.f32 %v4579_v52, %v4103_v36  ;;  %v1883_v38 = vadd.f32 %v1867_v8, %v1851_v40  ;;  %v4586_v36 = vld [vmem:[#allocation16_spill] sm:$0xff] }
 0x266   : > { %v793_v31 = vand.u32 2147483647, %v4572_v23  ;;  %v907_v22 = vand.u32 2147483647, %v4576_v34  ;;  %v1839_v29 = vmul.f32 5.0, %v1035_v6  ;;  %v1869_v60 = vmul.f32 -2.0, %v1821_v49 }
 0x267   : > { %v1023_v19 = vand.u32 2147483647, %v1007_v25  ;;  %v1599_v43 = vmul.f32 %v2310_v11, %v3752_v61  ;;  %v4582_v2 = vsub.f32 %v4580_v39, %v4581_v5  ;;  %v4584_v20 = vsub.f32 %v4583_v51, %v4575_v44  ;;  %1899 = vst [vmem:[%s4013_s11 + $0x20] sm:$0xff] %v1883_v38  ;;  %v4587_v56 = vld [vmem:[#allocation20_spill] sm:$0xff] }
 0x268   : > { %v2312_v0 = vpop.eup %2311  ;;  %v923_v12 = vadd.f32 %v907_v22, %v4585_v35  ;;  %v546_v27 = vmul.f32 %v4587_v56, %v4586_v36  ;;  %v1885_v17 = vadd.f32 %v1869_v60, %v1853_v26  ;;  %v1841_v61 = vmul.f32 5.0, %v1037_v41 }
 0x269   : > { %v693_v33 = vand.u32 2147483647, %v4582_v2  ;;  %v909_v28 = vand.u32 2147483647, %v4584_v20  ;;  %v1823_v10 = vsub.f32 %v1599_v43, %v4135_v9  ;;  %v1025_v50 = vand.u32 2147483647, %v1009_v54 }
 0x26a   : > { %v1601_v21 = vmul.f32 %v2312_v0, %v3958_v62  ;;  %v1855_v57 = vadd.f32 %v1839_v29, %v546_v27  ;;  %v1039_v1 = vadd.f32 %v1023_v19, %v923_v12  ;;  %1901 = vst [vmem:[%s4013_s11 + $0x30] sm:$0xff] %v1885_v17  ;;  %v548_v6 = vmul.f32 %v4589_v18, %v4588_v37 }
 0x26b   : > { %v809_v53 = vadd.f32 %v793_v31, %v693_v33  ;;  %v1871_v55 = vmul.f32 -2.0, %v1823_v10  ;;  %v550_v23 = vmul.f32 %v4590_v45, %v4065_v59 }
 0x26c   : > { %v1825_v13 = vsub.f32 %v1601_v21, %v4144_v16  ;;  %v1857_v9 = vadd.f32 %v1841_v61, %v548_v6  ;;  %v1843_v40 = vmul.f32 5.0, %v1039_v1 }
 0x26d   : > { %v925_v46 = vadd.f32 %v909_v28, %v809_v53  ;;  %v1887_v25 = vadd.f32 %v1871_v55, %v1855_v57  ;;  %v2314_v32 = vpop.eup %2313 }
 0x26e   : > { %v1873_v24 = vmul.f32 -2.0, %v1825_v13  ;;  %v1603_v62 = vmul.f32 %v2314_v32, %v4063_v7  ;;  %v1859_v44 = vadd.f32 %v1843_v40, %v550_v23 }
 0x26f   : > { %v1041_v4 = vadd.f32 %v1025_v50, %v925_v46  ;;  %1903 = vst [vmem:[%s4013_s11 + $0x40] sm:$0xff] %v1887_v25 }
 0x270   : > { %v1889_v8 = vadd.f32 %v1873_v24, %v1857_v9  ;;  %v2316_v48 = vpop.eup %2315  ;;  %v1827_v31 = vsub.f32 %v1603_v62, %v4157_v58 }
 0x271   : > { %v2318_v16 = vpop.eup %2317  ;;  %v1845_v30 = vmul.f32 5.0, %v1041_v4  ;;  %v1605_v47 = vmul.f32 %v2316_v48, %v4077_v14 }
 0x272   : > { %1905 = vst [vmem:[%s4013_s11 + $0x50] sm:$0xff] %v1889_v8  ;;  %v1875_v34 = vmul.f32 -2.0, %v1827_v31  ;;  %v552_v7 = vmul.f32 %v2318_v16, %v4043_v15 }
 0x273   : > { %v1829_v22 = vsub.f32 %v1605_v47, %v1813_v42 }
 0x274   : > { %v1891_v49 = vadd.f32 %v1875_v34, %v1859_v44  ;;  %v1861_v11 = vadd.f32 %v1845_v30, %v552_v7 }
 0x275   : > { %v1877_v59 = vmul.f32 -2.0, %v1829_v22 }
 0x276   : > { %1907 = vst [vmem:[%s4013_s11 + $0x60] sm:$0xff] %v1891_v49 }
 0x277   : > { %v1893_v14 = vadd.f32 %v1877_v59, %v1861_v11 }
 0x279   : > { %1909 = vst [vmem:[%s4013_s11 + $0x70] sm:$0xff] %v1893_v14 }
 0x27a   : > { %2335 = shalt.err (!%p2332_p3)
}
 0x27b   : > { %s2336_s30 = scalar_lea.hbm %s4214_s25, 2048  ;;  %s2340_s6 = scalar_lea.hbm %s4264_s3, 4096 }
 0x27c   : > { %p2337_p4 = scmp.ne.s32.totalorder %s4214_s25, %s2336_s30  ;;  %p2341_p9 = scmp.lt.s32.totalorder %s4214_s25, %s4264_s3 }
 0x27d   : > { %p2342_p10 = scmp.lt.s32.totalorder %s2340_s6, %s2336_s30 }
 0x27e   : > { %p2338_p7 = pnand %p2337_p4, %p2455_p5 }
 0x27f   : > { %p2343_p11 = por %p2342_p10, %p2341_p9 }
 0x280   : > { %p2339_p8 = pneg %p2338_p7 }
 0x282   : > { %p2344_p12 = pnand %p2343_p11, %p2339_p8 }
 0x284   : > { %2347 = shalt.err (!%p2344_p12)
}
 0x285   : > { %s2395_s9 = smov 128   ;;  %s2396_s10 = smov 8  }
 0x286   : > { %2122 = dma.vmem_to_hbm [thread:$0]  (%p2455_p5), %s4216_s19, 2048, %s4214_s25, %s4221_s26, %s2395_s9, %s2395_s9, %s2396_s10  }
 0x287 PF: > { %p2128_p13 = scmp.ge.s32.totalorder %s2382_s15, 2  ;;  %s1940_s11 = sand.u32 1, %s2370_s12  }
 0x288   : > { %s1941_s17 = scalar_lea.sflag [#allocation3], %s1940_s11 }
 0x289   : > { %p2125_p0 = pnand %p2128_p13, %p2459_p6 }
 0x28b   : > { %p2126_p1 = pneg %p2125_p0 }
 0x28d   : > { %2365 = dma.done.wait (%p2126_p1), %s1941_s17, 2048  }
 0x28e   : > { %2367 = vsyncadd (%p2126_p1), %s1941_s17, 4294965248  ;;  %p13_p2 = scmp.ge.s32.totalorder %s2442_s18, 4   ;;  %s4591_s12 = smov %s2374_s13 }
 0x28f   : > { %s4592_s13 = smov %s2378_s14  ;;  %s4593_s14 = smov %s2453_s21 }
 0x290   : > { %s4594_s15 = smov %s2442_s18  ;;  %15 = sbr.rel (!%p13_p2) target bundleno = 3 (0x3), region = 73 }
 0x295   :  { %1946 = vsyncpa [#allocation3], 1 }
 0x296   :  { %1948 = vsyncpa [#allocation3 + $0x1], 1 }

</bundles_post_ra>
